<compile_context>
chip_gen: v6e
topology: v6e:2x2x1
jax: 0.10.0
libtpu: 0.0.40
codegen_flags: <defaults>
</compile_context>

<pallas_src>
import functools
import math

import numpy as np
import jax
import jax.numpy as jnp
from jax.experimental import pallas as pl
from jax.experimental.pallas import tpu as pltpu


# ---------------------------------------------------------------------------
# Kernel helpers
# ---------------------------------------------------------------------------
def _layernorm(x, g, b, eps=1e-6):
    mu = jnp.mean(x, axis=-1, keepdims=True)
    var = jnp.mean((x - mu) ** 2, axis=-1, keepdims=True)
    return (x - mu) * jax.lax.rsqrt(var + eps) * g + b


# ---------------------------------------------------------------------------
# Kernel
# ---------------------------------------------------------------------------
def encoder1d_block_kernel(mask_ref, x_ref,
                           ln1g_ref, ln1b_ref,
                           wq_ref, wk_ref, wv_ref,
                           bq_ref, bk_ref, bv_ref,
                           wo_ref, bo_ref,
                           ln2g_ref, ln2b_ref,
                           w1_ref, b1_ref, w2_ref, b2_ref,
                           out_ref,
                           *, num_heads, block_batch, seq_len):
    Bt, S = block_batch, seq_len
    E = x_ref.shape[2]
    Dh = E // num_heads
    scale = jnp.float32(1.0 / math.sqrt(Dh))

    # (Bt, S, E) -> (Bt*S, E): LN / projections / MLP are row-wise, so folding the
    # batch tile into the matmul M dimension is exact and fills the MXU.
    x_in = x_ref[...].astype(jnp.float32).reshape(Bt * S, E)

    # --- LayerNorm 1 (f32) ---
    xn = _layernorm(x_in, ln1g_ref[0], ln1b_ref[0])
    xn_b = xn.astype(jnp.bfloat16)

    # --- QKV projections: bf16 operands, f32 accumulation ---
    q = (jnp.dot(xn_b, wq_ref[...], preferred_element_type=jnp.float32)
         + bq_ref[0]).astype(jnp.bfloat16)
    k = (jnp.dot(xn_b, wk_ref[...], preferred_element_type=jnp.float32)
         + bk_ref[0]).astype(jnp.bfloat16)
    v = (jnp.dot(xn_b, wv_ref[...], preferred_element_type=jnp.float32)
         + bv_ref[0]).astype(jnp.bfloat16)

    q3 = q.reshape(Bt, S, E)
    k3 = k.reshape(Bt, S, E)
    v3 = v.reshape(Bt, S, E)

    # Additive mask bias (0 or -1e9), broadcast over the batch tile.
    bias = mask_ref[...].astype(jnp.float32)[None, :, :]          # (1, S, S)

    # --- Scaled dot-product attention, per head (H is small; static unroll).
    #     Head outputs stay register-resident and are concatenated lane-dense
    #     before a single full-width Wo matmul (no narrow VMEM scratch stores).
    head_outs = []
    for h in range(num_heads):
        sl = slice(h * Dh, (h + 1) * Dh)
        qh = q3[:, :, sl]                                          # (Bt, S, Dh) bf16
        kh = k3[:, :, sl]
        vh = v3[:, :, sl]
        s = jnp.einsum('bqd,bkd->bqk', qh, kh,
                       preferred_element_type=jnp.float32) * scale
        s = s + bias
        s = s - jnp.max(s, axis=-1, keepdims=True)
        p = jnp.exp(s)
        p = p * pl.reciprocal(jnp.sum(p, axis=-1, keepdims=True), approx=True)
        head_outs.append(jnp.einsum('bqk,bkd->bqd', p.astype(jnp.bfloat16), vh,
                                    preferred_element_type=jnp.float32))

    attn = jnp.concatenate(head_outs, axis=-1).reshape(Bt * S, E)
    attn = jnp.dot(attn.astype(jnp.bfloat16), wo_ref[...],
                   preferred_element_type=jnp.float32) + bo_ref[0]

    # residual 1 (dropout is identity in deterministic mode)
    x1 = attn + x_in

    # --- LayerNorm 2 + MLP block ---
    y = _layernorm(x1, ln2g_ref[0], ln2b_ref[0]).astype(jnp.bfloat16)
    h1 = jnp.dot(y, w1_ref[...], preferred_element_type=jnp.float32) + b1_ref[0]
    # exact GELU (default of torch.nn.functional.gelu)
    h1 = 0.5 * h1 * (1.0 + jax.lax.erf(h1 * jnp.float32(1.0 / math.sqrt(2.0))))
    mlp_out = jnp.dot(h1.astype(jnp.bfloat16), w2_ref[...],
                      preferred_element_type=jnp.float32) + b2_ref[0]

    out_ref[...] = (x1 + mlp_out).reshape(Bt, S, E).astype(out_ref.dtype)


# ---------------------------------------------------------------------------
# Wrapper
# ---------------------------------------------------------------------------
def encoder1d_block(inputs, attention_mask, params, num_heads, block_batch=None):
    """inputs: (B, S, E) f32; attention_mask: (S, S) bool, True = not allowed."""
    B, S, E = inputs.shape
    assert E % num_heads == 0, "hidden size must be divisible by num_heads"
    mlp_dim = params["mlp_w1"].shape[0]

    # Pick the batch tile so each grid step feeds ~256 rows to the MXU (v6e/v7x
    # systolic height); fall back to the largest divisor of B that fits.
    if block_batch is None:
        target = max(1, 256 // S)
        block_batch = 1
        for cand in range(min(B, target), 0, -1):
            if B % cand == 0:
                block_batch = cand
                break
    Bt = block_batch
    assert B % Bt == 0
    grid = (B // Bt,)

    wdt = jnp.bfloat16

    # Split PyTorch-style fused in_proj (3E, E) / (3E,) into Q, K, V pieces and
    # pre-transpose all nn.Linear weights (out,in) -> (in,out) so the kernel does x @ W.
    wq, wk, wv = jnp.split(params["in_proj_weight"], 3, axis=0)
    bq, bk, bv = jnp.split(params["in_proj_bias"], 3, axis=0)
    wq_t, wk_t, wv_t = wq.T.astype(wdt), wk.T.astype(wdt), wv.T.astype(wdt)  # (E, E)
    wo_t = params["out_proj_weight"].T.astype(wdt)                           # (E, E)
    w1_t = params["mlp_w1"].T.astype(wdt)                                    # (E, mlp)
    w2_t = params["mlp_w2"].T.astype(wdt)                                    # (mlp, E)

    # Additive mask bias in bf16: -1e9 where attention is NOT allowed (PyTorch bool
    # semantics). Finite value avoids NaNs for fully-masked rows and halves the DMA
    # vs an int32 mask.
    mask_bias = jnp.where(attention_mask, jnp.float32(-1e9),
                          jnp.float32(0.0)).astype(jnp.bfloat16)

    row = lambda v: v.reshape(1, -1).astype(jnp.float32)

    full2d = lambda shape: pl.BlockSpec(shape, lambda b: (0, 0))

    kernel = functools.partial(encoder1d_block_kernel,
                               num_heads=num_heads, block_batch=Bt, seq_len=S)

    grid_spec = pltpu.PrefetchScalarGridSpec(
        num_scalar_prefetch=0,
        grid=grid,
        in_specs=[
            full2d((S, S)),                                    # mask bias (bf16)
            pl.BlockSpec((Bt, S, E), lambda b: (b, 0, 0)),     # inputs
            full2d((1, E)), full2d((1, E)),                    # ln1 gamma / beta
            full2d((E, E)), full2d((E, E)), full2d((E, E)),    # Wq, Wk, Wv (bf16, transposed)
            full2d((1, E)), full2d((1, E)), full2d((1, E)),    # bq, bk, bv
            full2d((E, E)), full2d((1, E)),                    # Wo (bf16, transposed), bo
            full2d((1, E)), full2d((1, E)),                    # ln2 gamma / beta
            full2d((E, mlp_dim)), full2d((1, mlp_dim)),        # W1 (bf16, transposed), b1
            full2d((mlp_dim, E)), full2d((1, E)),              # W2 (bf16, transposed), b2
        ],
        out_specs=pl.BlockSpec((Bt, S, E), lambda b: (b, 0, 0)),
    )

    return pl.pallas_call(
        kernel,
        out_shape=jax.ShapeDtypeStruct((B, S, E), inputs.dtype),
        grid_spec=grid_spec,
        compiler_params=pltpu.CompilerParams(dimension_semantics=("parallel",)),
    )(mask_bias, inputs,
      row(params["ln1_gamma"]), row(params["ln1_beta"]),
      wq_t, wk_t, wv_t, row(bq), row(bk), row(bv),
      wo_t, row(params["out_proj_bias"]),
      row(params["ln2_gamma"]), row(params["ln2_beta"]),
      w1_t, row(params["mlp_b1"]), w2_t, row(params["mlp_b2"]))


# ---------------------------------------------------------------------------
# Pure-JAX reference (mirrors the PyTorch forward with deterministic=True, f32)
# ---------------------------------------------------------------------------
def reference(inputs, attention_mask, params, num_heads):
    def ln(x, g, b):
        mu = x.mean(-1, keepdims=True)
        var = ((x - mu) ** 2).mean(-1, keepdims=True)
        return (x - mu) / jnp.sqrt(var + 1e-6) * g + b

    B, S, E = inputs.shape
    Dh = E // num_heads
    xn = ln(inputs, params["ln1_gamma"], params["ln1_beta"])
    wq, wk, wv = jnp.split(params["in_proj_weight"], 3, axis=0)
    bq, bk, bv = jnp.split(params["in_proj_bias"], 3, axis=0)
    q = xn @ wq.T + bq
    k = xn @ wk.T + bk
    v = xn @ wv.T + bv
    q = q.reshape(B, S, num_heads, Dh).transpose(0, 2, 1, 3)
    k = k.reshape(B, S, num_heads, Dh).transpose(0, 2, 1, 3)
    v = v.reshape(B, S, num_heads, Dh).transpose(0, 2, 1, 3)
    scores = jnp.einsum("bhqd,bhkd->bhqk", q, k) / jnp.sqrt(jnp.float32(Dh))
    scores = jnp.where(attention_mask[None, None], -jnp.inf, scores)
    p = jax.nn.softmax(scores, axis=-1)
    o = jnp.einsum("bhqk,bhkd->bhqd", p, v).transpose(0, 2, 1, 3).reshape(B, S, E)
    attn = o @ params["out_proj_weight"].T + params["out_proj_bias"]
    x1 = attn + inputs
    y = ln(x1, params["ln2_gamma"], params["ln2_beta"])
    h = y @ params["mlp_w1"].T + params["mlp_b1"]
    h = 0.5 * h * (1.0 + jax.lax.erf(h / jnp.sqrt(jnp.float32(2.0))))
    mlp_out = h @ params["mlp_w2"].T + params["mlp_b2"]
    return x1 + mlp_out


# ---------------------------------------------------------------------------
# Main
# ---------------------------------------------------------------------------
if __name__ == "__main__":
    B, S, E, H, MLP = 2, 8, 32, 4, 64

    key = jax.random.PRNGKey(0)
    keys = jax.random.split(key, 8)

    inputs = jax.random.normal(keys[0], (B, S, E), dtype=jnp.float32)
    # Causal-style bool mask: True above the diagonal = not allowed to attend (PyTorch semantics).
    attn_mask = jnp.triu(jnp.ones((S, S), dtype=bool), k=1)

    std = 0.02
    params = {
        "ln1_gamma": jnp.ones((E,), jnp.float32),
        "ln1_beta": jnp.zeros((E,), jnp.float32),
        "in_proj_weight": std * jax.random.normal(keys[1], (3 * E, E), jnp.float32),
        "in_proj_bias": std * jax.random.normal(keys[2], (3 * E,), jnp.float32),
        "out_proj_weight": std * jax.random.normal(keys[3], (E, E), jnp.float32),
        "out_proj_bias": jnp.zeros((E,), jnp.float32),
        "ln2_gamma": jnp.ones((E,), jnp.float32),
        "ln2_beta": jnp.zeros((E,), jnp.float32),
        "mlp_w1": std * jax.random.normal(keys[4], (MLP, E), jnp.float32),
        "mlp_b1": std * jax.random.normal(keys[5], (MLP,), jnp.float32),
        "mlp_w2": std * jax.random.normal(keys[6], (E, MLP), jnp.float32),
        "mlp_b2": std * jax.random.normal(keys[7], (E,), jnp.float32),
    }

    out = encoder1d_block(inputs, attn_mask, params, num_heads=H)
    out = jax.block_until_ready(out)

    ref = reference(inputs, attn_mask, params, num_heads=H)
    # bf16 MXU operands with f32 accumulation -> compare with a bf16-appropriate tolerance.
    np.testing.assert_allclose(np.asarray(out), np.asarray(ref), rtol=1e-2, atol=1e-2)

    print("KERNEL_OK")
</pallas_src>

<mosaic_0001>
module attributes {stable_mosaic.version = 11 : i64} {
  func.func @encoder1d_block_kernel(%arg0: i32, %arg1: memref<8x8xbf16, #tpu.memory_space<vmem>>, %arg2: memref<2x8x32xf32, #tpu.memory_space<vmem>>, %arg3: memref<1x32xf32, #tpu.memory_space<vmem>>, %arg4: memref<1x32xf32, #tpu.memory_space<vmem>>, %arg5: memref<32x32xbf16, #tpu.memory_space<vmem>>, %arg6: memref<32x32xbf16, #tpu.memory_space<vmem>>, %arg7: memref<32x32xbf16, #tpu.memory_space<vmem>>, %arg8: memref<1x32xf32, #tpu.memory_space<vmem>>, %arg9: memref<1x32xf32, #tpu.memory_space<vmem>>, %arg10: memref<1x32xf32, #tpu.memory_space<vmem>>, %arg11: memref<32x32xbf16, #tpu.memory_space<vmem>>, %arg12: memref<1x32xf32, #tpu.memory_space<vmem>>, %arg13: memref<1x32xf32, #tpu.memory_space<vmem>>, %arg14: memref<1x32xf32, #tpu.memory_space<vmem>>, %arg15: memref<32x64xbf16, #tpu.memory_space<vmem>>, %arg16: memref<1x64xf32, #tpu.memory_space<vmem>>, %arg17: memref<64x32xbf16, #tpu.memory_space<vmem>>, %arg18: memref<1x32xf32, #tpu.memory_space<vmem>>, %arg19: memref<2x8x32xf32, #tpu.memory_space<vmem>>) attributes {dimension_semantics = [#tpu.dimension_semantics<parallel>], iteration_bounds = array<i64: 1>, scalar_prefetch = 0 : i64, scratch_operands = 0 : i64, tpu.core_type = #tpu.core_type<tc>, window_params = [{pipeline_mode = #tpu.pipeline_mode<synchronous>, transform_indices = @transform_0, window_bounds = array<i64: 8, 8>}, {transform_indices = @transform_1, window_bounds = array<i64: 2, 8, 32>}, {pipeline_mode = #tpu.pipeline_mode<synchronous>, transform_indices = @transform_2, window_bounds = array<i64: 1, 32>}, {pipeline_mode = #tpu.pipeline_mode<synchronous>, transform_indices = @transform_3, window_bounds = array<i64: 1, 32>}, {pipeline_mode = #tpu.pipeline_mode<synchronous>, transform_indices = @transform_4, window_bounds = array<i64: 32, 32>}, {pipeline_mode = #tpu.pipeline_mode<synchronous>, transform_indices = @transform_5, window_bounds = array<i64: 32, 32>}, {pipeline_mode = #tpu.pipeline_mode<synchronous>, transform_indices = @transform_6, window_bounds = array<i64: 32, 32>}, {pipeline_mode = #tpu.pipeline_mode<synchronous>, transform_indices = @transform_7, window_bounds = array<i64: 1, 32>}, {pipeline_mode = #tpu.pipeline_mode<synchronous>, transform_indices = @transform_8, window_bounds = array<i64: 1, 32>}, {pipeline_mode = #tpu.pipeline_mode<synchronous>, transform_indices = @transform_9, window_bounds = array<i64: 1, 32>}, {pipeline_mode = #tpu.pipeline_mode<synchronous>, transform_indices = @transform_10, window_bounds = array<i64: 32, 32>}, {pipeline_mode = #tpu.pipeline_mode<synchronous>, transform_indices = @transform_11, window_bounds = array<i64: 1, 32>}, {pipeline_mode = #tpu.pipeline_mode<synchronous>, transform_indices = @transform_12, window_bounds = array<i64: 1, 32>}, {pipeline_mode = #tpu.pipeline_mode<synchronous>, transform_indices = @transform_13, window_bounds = array<i64: 1, 32>}, {pipeline_mode = #tpu.pipeline_mode<synchronous>, transform_indices = @transform_14, window_bounds = array<i64: 32, 64>}, {pipeline_mode = #tpu.pipeline_mode<synchronous>, transform_indices = @transform_15, window_bounds = array<i64: 1, 64>}, {pipeline_mode = #tpu.pipeline_mode<synchronous>, transform_indices = @transform_16, window_bounds = array<i64: 64, 32>}, {pipeline_mode = #tpu.pipeline_mode<synchronous>, transform_indices = @transform_17, window_bounds = array<i64: 1, 32>}, {transform_indices = @transform_18, window_bounds = array<i64: 2, 8, 32>}]} {
    %c0 = arith.constant 0 : index
    %c0_0 = arith.constant 0 : index
    %c0_1 = arith.constant 0 : index
    %0 = vector.load %arg2[%c0, %c0_0, %c0_1] : memref<2x8x32xf32, #tpu.memory_space<vmem>>, vector<2x8x32xf32>
    %1 = vector.shape_cast %0 : vector<2x8x32xf32> to vector<16x32xf32>
    %c0_2 = arith.constant 0 : index
    %c0_3 = arith.constant 0 : index
    %2 = vector.load %arg3[%c0_2, %c0_3] : memref<1x32xf32, #tpu.memory_space<vmem>>, vector<1x32xf32>
    %3 = vector.shape_cast %2 : vector<1x32xf32> to vector<32xf32>
    %c0_4 = arith.constant 0 : index
    %c0_5 = arith.constant 0 : index
    %4 = vector.load %arg4[%c0_4, %c0_5] : memref<1x32xf32, #tpu.memory_space<vmem>>, vector<1x32xf32>
    %5 = vector.shape_cast %4 : vector<1x32xf32> to vector<32xf32>
    %cst = arith.constant dense<0.000000e+00> : vector<16xf32>
    %6 = vector.multi_reduction <add>, %1, %cst [1] : vector<16x32xf32> to vector<16xf32>
    %7 = vector.shape_cast %6 : vector<16xf32> to vector<16x1xf32>
    %cst_6 = arith.constant 3.200000e+01 : f32
    %8 = vector.broadcast %cst_6 : f32 to vector<16x1xf32>
    %9 = arith.divf %7, %8 : vector<16x1xf32>
    %10 = vector.broadcast %9 : vector<16x1xf32> to vector<16x32xf32>
    %11 = arith.subf %1, %10 : vector<16x32xf32>
    %12 = arith.mulf %11, %11 : vector<16x32xf32>
    %cst_7 = arith.constant dense<0.000000e+00> : vector<16xf32>
    %13 = vector.multi_reduction <add>, %12, %cst_7 [1] : vector<16x32xf32> to vector<16xf32>
    %14 = vector.shape_cast %13 : vector<16xf32> to vector<16x1xf32>
    %cst_8 = arith.constant 3.200000e+01 : f32
    %15 = vector.broadcast %cst_8 : f32 to vector<16x1xf32>
    %16 = arith.divf %14, %15 : vector<16x1xf32>
    %17 = vector.broadcast %9 : vector<16x1xf32> to vector<16x32xf32>
    %18 = arith.subf %1, %17 : vector<16x32xf32>
    %cst_9 = arith.constant 9.99999997E-7 : f32
    %19 = vector.broadcast %cst_9 : f32 to vector<16x1xf32>
    %20 = arith.addf %16, %19 : vector<16x1xf32>
    %21 = math.rsqrt %20 : vector<16x1xf32>
    %22 = vector.broadcast %21 : vector<16x1xf32> to vector<16x32xf32>
    %23 = arith.mulf %18, %22 : vector<16x32xf32>
    %24 = vector.shape_cast %3 : vector<32xf32> to vector<1x32xf32>
    %25 = vector.broadcast %24 : vector<1x32xf32> to vector<16x32xf32>
    %26 = arith.mulf %23, %25 : vector<16x32xf32>
    %27 = vector.shape_cast %5 : vector<32xf32> to vector<1x32xf32>
    %28 = vector.broadcast %27 : vector<1x32xf32> to vector<16x32xf32>
    %29 = arith.addf %26, %28 : vector<16x32xf32>
    %30 = arith.truncf %29 : vector<16x32xf32> to vector<16x32xbf16>
    %c0_10 = arith.constant 0 : index
    %c0_11 = arith.constant 0 : index
    %31 = vector.load %arg5[%c0_10, %c0_11] : memref<32x32xbf16, #tpu.memory_space<vmem>>, vector<32x32xbf16>
    %cst_12 = arith.constant dense<0.000000e+00> : vector<16x32xf32>
    %32 = tpu.matmul %30, %31, %cst_12 {dimension_numbers = #tpu.dot_dimension_numbers<[1], [0], [0], [1], [0, 0, 1, 1], [], []>} : vector<16x32xbf16>, vector<32x32xbf16>, vector<16x32xf32> -> vector<16x32xf32>
    %c0_13 = arith.constant 0 : index
    %c0_14 = arith.constant 0 : index
    %33 = vector.load %arg8[%c0_13, %c0_14] : memref<1x32xf32, #tpu.memory_space<vmem>>, vector<1x32xf32>
    %34 = vector.shape_cast %33 : vector<1x32xf32> to vector<32xf32>
    %35 = vector.shape_cast %34 : vector<32xf32> to vector<1x32xf32>
    %36 = vector.broadcast %35 : vector<1x32xf32> to vector<16x32xf32>
    %37 = arith.addf %32, %36 : vector<16x32xf32>
    %38 = arith.truncf %37 : vector<16x32xf32> to vector<16x32xbf16>
    %c0_15 = arith.constant 0 : index
    %c0_16 = arith.constant 0 : index
    %39 = vector.load %arg6[%c0_15, %c0_16] : memref<32x32xbf16, #tpu.memory_space<vmem>>, vector<32x32xbf16>
    %cst_17 = arith.constant dense<0.000000e+00> : vector<16x32xf32>
    %40 = tpu.matmul %30, %39, %cst_17 {dimension_numbers = #tpu.dot_dimension_numbers<[1], [0], [0], [1], [0, 0, 1, 1], [], []>} : vector<16x32xbf16>, vector<32x32xbf16>, vector<16x32xf32> -> vector<16x32xf32>
    %c0_18 = arith.constant 0 : index
    %c0_19 = arith.constant 0 : index
    %41 = vector.load %arg9[%c0_18, %c0_19] : memref<1x32xf32, #tpu.memory_space<vmem>>, vector<1x32xf32>
    %42 = vector.shape_cast %41 : vector<1x32xf32> to vector<32xf32>
    %43 = vector.shape_cast %42 : vector<32xf32> to vector<1x32xf32>
    %44 = vector.broadcast %43 : vector<1x32xf32> to vector<16x32xf32>
    %45 = arith.addf %40, %44 : vector<16x32xf32>
    %46 = arith.truncf %45 : vector<16x32xf32> to vector<16x32xbf16>
    %c0_20 = arith.constant 0 : index
    %c0_21 = arith.constant 0 : index
    %47 = vector.load %arg7[%c0_20, %c0_21] : memref<32x32xbf16, #tpu.memory_space<vmem>>, vector<32x32xbf16>
    %cst_22 = arith.constant dense<0.000000e+00> : vector<16x32xf32>
    %48 = tpu.matmul %30, %47, %cst_22 {dimension_numbers = #tpu.dot_dimension_numbers<[1], [0], [0], [1], [0, 0, 1, 1], [], []>} : vector<16x32xbf16>, vector<32x32xbf16>, vector<16x32xf32> -> vector<16x32xf32>
    %c0_23 = arith.constant 0 : index
    %c0_24 = arith.constant 0 : index
    %49 = vector.load %arg10[%c0_23, %c0_24] : memref<1x32xf32, #tpu.memory_space<vmem>>, vector<1x32xf32>
    %50 = vector.shape_cast %49 : vector<1x32xf32> to vector<32xf32>
    %51 = vector.shape_cast %50 : vector<32xf32> to vector<1x32xf32>
    %52 = vector.broadcast %51 : vector<1x32xf32> to vector<16x32xf32>
    %53 = arith.addf %48, %52 : vector<16x32xf32>
    %54 = arith.truncf %53 : vector<16x32xf32> to vector<16x32xbf16>
    %55 = vector.shape_cast %38 : vector<16x32xbf16> to vector<2x8x32xbf16>
    %56 = vector.shape_cast %46 : vector<16x32xbf16> to vector<2x8x32xbf16>
    %57 = vector.shape_cast %54 : vector<16x32xbf16> to vector<2x8x32xbf16>
    %c0_25 = arith.constant 0 : index
    %c0_26 = arith.constant 0 : index
    %58 = vector.load %arg1[%c0_25, %c0_26] : memref<8x8xbf16, #tpu.memory_space<vmem>>, vector<8x8xbf16>
    %59 = arith.extf %58 : vector<8x8xbf16> to vector<8x8xf32>
    %60 = vector.shape_cast %59 : vector<8x8xf32> to vector<1x8x8xf32>
    %61 = vector.extract_strided_slice %55 {offsets = [0, 0, 0], sizes = [2, 8, 8], strides = [1, 1, 1]} : vector<2x8x32xbf16> to vector<2x8x8xbf16>
    %62 = vector.extract_strided_slice %56 {offsets = [0, 0, 0], sizes = [2, 8, 8], strides = [1, 1, 1]} : vector<2x8x32xbf16> to vector<2x8x8xbf16>
    %63 = vector.extract_strided_slice %57 {offsets = [0, 0, 0], sizes = [2, 8, 8], strides = [1, 1, 1]} : vector<2x8x32xbf16> to vector<2x8x8xbf16>
    "tpu.trace_start"() <{level = 10 : i32, message = "bqd,bkd->bqk"}> : () -> ()
    %cst_27 = arith.constant dense<0.000000e+00> : vector<2x8x8xf32>
    %64 = tpu.matmul %61, %62, %cst_27 {dimension_numbers = #tpu.dot_dimension_numbers<[2], [2], [1], [1], [0, 0, 0, 1, 1, 1], [0], [0]>} : vector<2x8x8xbf16>, vector<2x8x8xbf16>, vector<2x8x8xf32> -> vector<2x8x8xf32>
    "tpu.trace_stop"() : () -> ()
    %cst_28 = arith.constant 0.353553385 : f32
    %65 = vector.broadcast %cst_28 : f32 to vector<2x8x8xf32>
    %66 = arith.mulf %64, %65 : vector<2x8x8xf32>
    %67 = vector.broadcast %60 : vector<1x8x8xf32> to vector<2x8x8xf32>
    %68 = arith.addf %66, %67 : vector<2x8x8xf32>
    %cst_29 = arith.constant dense<0xFF800000> : vector<2x8xf32>
    %69 = vector.multi_reduction <maximumf>, %68, %cst_29 [2] : vector<2x8x8xf32> to vector<2x8xf32>
    %70 = vector.shape_cast %69 : vector<2x8xf32> to vector<2x8x1xf32>
    %71 = vector.broadcast %70 : vector<2x8x1xf32> to vector<2x8x8xf32>
    %72 = arith.subf %68, %71 : vector<2x8x8xf32>
    %73 = math.exp %72 : vector<2x8x8xf32>
    %cst_30 = arith.constant dense<0.000000e+00> : vector<2x8xf32>
    %74 = vector.multi_reduction <add>, %73, %cst_30 [2] : vector<2x8x8xf32> to vector<2x8xf32>
    %75 = vector.shape_cast %74 : vector<2x8xf32> to vector<2x8x1xf32>
    %76 = tpu.reciprocal %75 {approx = true} : vector<2x8x1xf32> -> vector<2x8x1xf32>
    %77 = vector.broadcast %76 : vector<2x8x1xf32> to vector<2x8x8xf32>
    %78 = arith.mulf %73, %77 : vector<2x8x8xf32>
    %79 = arith.truncf %78 : vector<2x8x8xf32> to vector<2x8x8xbf16>
    "tpu.trace_start"() <{level = 10 : i32, message = "bqk,bkd->bqd"}> : () -> ()
    %cst_31 = arith.constant dense<0.000000e+00> : vector<2x8x8xf32>
    %80 = tpu.matmul %79, %63, %cst_31 {dimension_numbers = #tpu.dot_dimension_numbers<[2], [1], [1], [2], [0, 0, 0, 1, 1, 2], [0], [0]>} : vector<2x8x8xbf16>, vector<2x8x8xbf16>, vector<2x8x8xf32> -> vector<2x8x8xf32>
    "tpu.trace_stop"() : () -> ()
    %81 = vector.extract_strided_slice %55 {offsets = [0, 0, 8], sizes = [2, 8, 8], strides = [1, 1, 1]} : vector<2x8x32xbf16> to vector<2x8x8xbf16>
    %82 = vector.extract_strided_slice %56 {offsets = [0, 0, 8], sizes = [2, 8, 8], strides = [1, 1, 1]} : vector<2x8x32xbf16> to vector<2x8x8xbf16>
    %83 = vector.extract_strided_slice %57 {offsets = [0, 0, 8], sizes = [2, 8, 8], strides = [1, 1, 1]} : vector<2x8x32xbf16> to vector<2x8x8xbf16>
    "tpu.trace_start"() <{level = 10 : i32, message = "bqd,bkd->bqk"}> : () -> ()
    %cst_32 = arith.constant dense<0.000000e+00> : vector<2x8x8xf32>
    %84 = tpu.matmul %81, %82, %cst_32 {dimension_numbers = #tpu.dot_dimension_numbers<[2], [2], [1], [1], [0, 0, 0, 1, 1, 1], [0], [0]>} : vector<2x8x8xbf16>, vector<2x8x8xbf16>, vector<2x8x8xf32> -> vector<2x8x8xf32>
    "tpu.trace_stop"() : () -> ()
    %cst_33 = arith.constant 0.353553385 : f32
    %85 = vector.broadcast %cst_33 : f32 to vector<2x8x8xf32>
    %86 = arith.mulf %84, %85 : vector<2x8x8xf32>
    %87 = vector.broadcast %60 : vector<1x8x8xf32> to vector<2x8x8xf32>
    %88 = arith.addf %86, %87 : vector<2x8x8xf32>
    %cst_34 = arith.constant dense<0xFF800000> : vector<2x8xf32>
    %89 = vector.multi_reduction <maximumf>, %88, %cst_34 [2] : vector<2x8x8xf32> to vector<2x8xf32>
    %90 = vector.shape_cast %89 : vector<2x8xf32> to vector<2x8x1xf32>
    %91 = vector.broadcast %90 : vector<2x8x1xf32> to vector<2x8x8xf32>
    %92 = arith.subf %88, %91 : vector<2x8x8xf32>
    %93 = math.exp %92 : vector<2x8x8xf32>
    %cst_35 = arith.constant dense<0.000000e+00> : vector<2x8xf32>
    %94 = vector.multi_reduction <add>, %93, %cst_35 [2] : vector<2x8x8xf32> to vector<2x8xf32>
    %95 = vector.shape_cast %94 : vector<2x8xf32> to vector<2x8x1xf32>
    %96 = tpu.reciprocal %95 {approx = true} : vector<2x8x1xf32> -> vector<2x8x1xf32>
    %97 = vector.broadcast %96 : vector<2x8x1xf32> to vector<2x8x8xf32>
    %98 = arith.mulf %93, %97 : vector<2x8x8xf32>
    %99 = arith.truncf %98 : vector<2x8x8xf32> to vector<2x8x8xbf16>
    "tpu.trace_start"() <{level = 10 : i32, message = "bqk,bkd->bqd"}> : () -> ()
    %cst_36 = arith.constant dense<0.000000e+00> : vector<2x8x8xf32>
    %100 = tpu.matmul %99, %83, %cst_36 {dimension_numbers = #tpu.dot_dimension_numbers<[2], [1], [1], [2], [0, 0, 0, 1, 1, 2], [0], [0]>} : vector<2x8x8xbf16>, vector<2x8x8xbf16>, vector<2x8x8xf32> -> vector<2x8x8xf32>
    "tpu.trace_stop"() : () -> ()
    %101 = vector.extract_strided_slice %55 {offsets = [0, 0, 16], sizes = [2, 8, 8], strides = [1, 1, 1]} : vector<2x8x32xbf16> to vector<2x8x8xbf16>
    %102 = vector.extract_strided_slice %56 {offsets = [0, 0, 16], sizes = [2, 8, 8], strides = [1, 1, 1]} : vector<2x8x32xbf16> to vector<2x8x8xbf16>
    %103 = vector.extract_strided_slice %57 {offsets = [0, 0, 16], sizes = [2, 8, 8], strides = [1, 1, 1]} : vector<2x8x32xbf16> to vector<2x8x8xbf16>
    "tpu.trace_start"() <{level = 10 : i32, message = "bqd,bkd->bqk"}> : () -> ()
    %cst_37 = arith.constant dense<0.000000e+00> : vector<2x8x8xf32>
    %104 = tpu.matmul %101, %102, %cst_37 {dimension_numbers = #tpu.dot_dimension_numbers<[2], [2], [1], [1], [0, 0, 0, 1, 1, 1], [0], [0]>} : vector<2x8x8xbf16>, vector<2x8x8xbf16>, vector<2x8x8xf32> -> vector<2x8x8xf32>
    "tpu.trace_stop"() : () -> ()
    %cst_38 = arith.constant 0.353553385 : f32
    %105 = vector.broadcast %cst_38 : f32 to vector<2x8x8xf32>
    %106 = arith.mulf %104, %105 : vector<2x8x8xf32>
    %107 = vector.broadcast %60 : vector<1x8x8xf32> to vector<2x8x8xf32>
    %108 = arith.addf %106, %107 : vector<2x8x8xf32>
    %cst_39 = arith.constant dense<0xFF800000> : vector<2x8xf32>
    %109 = vector.multi_reduction <maximumf>, %108, %cst_39 [2] : vector<2x8x8xf32> to vector<2x8xf32>
    %110 = vector.shape_cast %109 : vector<2x8xf32> to vector<2x8x1xf32>
    %111 = vector.broadcast %110 : vector<2x8x1xf32> to vector<2x8x8xf32>
    %112 = arith.subf %108, %111 : vector<2x8x8xf32>
    %113 = math.exp %112 : vector<2x8x8xf32>
    %cst_40 = arith.constant dense<0.000000e+00> : vector<2x8xf32>
    %114 = vector.multi_reduction <add>, %113, %cst_40 [2] : vector<2x8x8xf32> to vector<2x8xf32>
    %115 = vector.shape_cast %114 : vector<2x8xf32> to vector<2x8x1xf32>
    %116 = tpu.reciprocal %115 {approx = true} : vector<2x8x1xf32> -> vector<2x8x1xf32>
    %117 = vector.broadcast %116 : vector<2x8x1xf32> to vector<2x8x8xf32>
    %118 = arith.mulf %113, %117 : vector<2x8x8xf32>
    %119 = arith.truncf %118 : vector<2x8x8xf32> to vector<2x8x8xbf16>
    "tpu.trace_start"() <{level = 10 : i32, message = "bqk,bkd->bqd"}> : () -> ()
    %cst_41 = arith.constant dense<0.000000e+00> : vector<2x8x8xf32>
    %120 = tpu.matmul %119, %103, %cst_41 {dimension_numbers = #tpu.dot_dimension_numbers<[2], [1], [1], [2], [0, 0, 0, 1, 1, 2], [0], [0]>} : vector<2x8x8xbf16>, vector<2x8x8xbf16>, vector<2x8x8xf32> -> vector<2x8x8xf32>
    "tpu.trace_stop"() : () -> ()
    %121 = vector.extract_strided_slice %55 {offsets = [0, 0, 24], sizes = [2, 8, 8], strides = [1, 1, 1]} : vector<2x8x32xbf16> to vector<2x8x8xbf16>
    %122 = vector.extract_strided_slice %56 {offsets = [0, 0, 24], sizes = [2, 8, 8], strides = [1, 1, 1]} : vector<2x8x32xbf16> to vector<2x8x8xbf16>
    %123 = vector.extract_strided_slice %57 {offsets = [0, 0, 24], sizes = [2, 8, 8], strides = [1, 1, 1]} : vector<2x8x32xbf16> to vector<2x8x8xbf16>
    "tpu.trace_start"() <{level = 10 : i32, message = "bqd,bkd->bqk"}> : () -> ()
    %cst_42 = arith.constant dense<0.000000e+00> : vector<2x8x8xf32>
    %124 = tpu.matmul %121, %122, %cst_42 {dimension_numbers = #tpu.dot_dimension_numbers<[2], [2], [1], [1], [0, 0, 0, 1, 1, 1], [0], [0]>} : vector<2x8x8xbf16>, vector<2x8x8xbf16>, vector<2x8x8xf32> -> vector<2x8x8xf32>
    "tpu.trace_stop"() : () -> ()
    %cst_43 = arith.constant 0.353553385 : f32
    %125 = vector.broadcast %cst_43 : f32 to vector<2x8x8xf32>
    %126 = arith.mulf %124, %125 : vector<2x8x8xf32>
    %127 = vector.broadcast %60 : vector<1x8x8xf32> to vector<2x8x8xf32>
    %128 = arith.addf %126, %127 : vector<2x8x8xf32>
    %cst_44 = arith.constant dense<0xFF800000> : vector<2x8xf32>
    %129 = vector.multi_reduction <maximumf>, %128, %cst_44 [2] : vector<2x8x8xf32> to vector<2x8xf32>
    %130 = vector.shape_cast %129 : vector<2x8xf32> to vector<2x8x1xf32>
    %131 = vector.broadcast %130 : vector<2x8x1xf32> to vector<2x8x8xf32>
    %132 = arith.subf %128, %131 : vector<2x8x8xf32>
    %133 = math.exp %132 : vector<2x8x8xf32>
    %cst_45 = arith.constant dense<0.000000e+00> : vector<2x8xf32>
    %134 = vector.multi_reduction <add>, %133, %cst_45 [2] : vector<2x8x8xf32> to vector<2x8xf32>
    %135 = vector.shape_cast %134 : vector<2x8xf32> to vector<2x8x1xf32>
    %136 = tpu.reciprocal %135 {approx = true} : vector<2x8x1xf32> -> vector<2x8x1xf32>
    %137 = vector.broadcast %136 : vector<2x8x1xf32> to vector<2x8x8xf32>
    %138 = arith.mulf %133, %137 : vector<2x8x8xf32>
    %139 = arith.truncf %138 : vector<2x8x8xf32> to vector<2x8x8xbf16>
    "tpu.trace_start"() <{level = 10 : i32, message = "bqk,bkd->bqd"}> : () -> ()
    %cst_46 = arith.constant dense<0.000000e+00> : vector<2x8x8xf32>
    %140 = tpu.matmul %139, %123, %cst_46 {dimension_numbers = #tpu.dot_dimension_numbers<[2], [1], [1], [2], [0, 0, 0, 1, 1, 2], [0], [0]>} : vector<2x8x8xbf16>, vector<2x8x8xbf16>, vector<2x8x8xf32> -> vector<2x8x8xf32>
    "tpu.trace_stop"() : () -> ()
    %141 = tpu.concatenate %80, %100, %120, %140 in 2 : vector<2x8x8xf32>, vector<2x8x8xf32>, vector<2x8x8xf32>, vector<2x8x8xf32> -> vector<2x8x32xf32>
    %142 = vector.shape_cast %141 : vector<2x8x32xf32> to vector<16x32xf32>
    %143 = arith.truncf %142 : vector<16x32xf32> to vector<16x32xbf16>
    %c0_47 = arith.constant 0 : index
    %c0_48 = arith.constant 0 : index
    %144 = vector.load %arg11[%c0_47, %c0_48] : memref<32x32xbf16, #tpu.memory_space<vmem>>, vector<32x32xbf16>
    %cst_49 = arith.constant dense<0.000000e+00> : vector<16x32xf32>
    %145 = tpu.matmul %143, %144, %cst_49 {dimension_numbers = #tpu.dot_dimension_numbers<[1], [0], [0], [1], [0, 0, 1, 1], [], []>} : vector<16x32xbf16>, vector<32x32xbf16>, vector<16x32xf32> -> vector<16x32xf32>
    %c0_50 = arith.constant 0 : index
    %c0_51 = arith.constant 0 : index
    %146 = vector.load %arg12[%c0_50, %c0_51] : memref<1x32xf32, #tpu.memory_space<vmem>>, vector<1x32xf32>
    %147 = vector.shape_cast %146 : vector<1x32xf32> to vector<32xf32>
    %148 = vector.shape_cast %147 : vector<32xf32> to vector<1x32xf32>
    %149 = vector.broadcast %148 : vector<1x32xf32> to vector<16x32xf32>
    %150 = arith.addf %145, %149 : vector<16x32xf32>
    %151 = arith.addf %150, %1 : vector<16x32xf32>
    %c0_52 = arith.constant 0 : index
    %c0_53 = arith.constant 0 : index
    %152 = vector.load %arg13[%c0_52, %c0_53] : memref<1x32xf32, #tpu.memory_space<vmem>>, vector<1x32xf32>
    %153 = vector.shape_cast %152 : vector<1x32xf32> to vector<32xf32>
    %c0_54 = arith.constant 0 : index
    %c0_55 = arith.constant 0 : index
    %154 = vector.load %arg14[%c0_54, %c0_55] : memref<1x32xf32, #tpu.memory_space<vmem>>, vector<1x32xf32>
    %155 = vector.shape_cast %154 : vector<1x32xf32> to vector<32xf32>
    %cst_56 = arith.constant dense<0.000000e+00> : vector<16xf32>
    %156 = vector.multi_reduction <add>, %151, %cst_56 [1] : vector<16x32xf32> to vector<16xf32>
    %157 = vector.shape_cast %156 : vector<16xf32> to vector<16x1xf32>
    %cst_57 = arith.constant 3.200000e+01 : f32
    %158 = vector.broadcast %cst_57 : f32 to vector<16x1xf32>
    %159 = arith.divf %157, %158 : vector<16x1xf32>
    %160 = vector.broadcast %159 : vector<16x1xf32> to vector<16x32xf32>
    %161 = arith.subf %151, %160 : vector<16x32xf32>
    %162 = arith.mulf %161, %161 : vector<16x32xf32>
    %cst_58 = arith.constant dense<0.000000e+00> : vector<16xf32>
    %163 = vector.multi_reduction <add>, %162, %cst_58 [1] : vector<16x32xf32> to vector<16xf32>
    %164 = vector.shape_cast %163 : vector<16xf32> to vector<16x1xf32>
    %cst_59 = arith.constant 3.200000e+01 : f32
    %165 = vector.broadcast %cst_59 : f32 to vector<16x1xf32>
    %166 = arith.divf %164, %165 : vector<16x1xf32>
    %167 = vector.broadcast %159 : vector<16x1xf32> to vector<16x32xf32>
    %168 = arith.subf %151, %167 : vector<16x32xf32>
    %cst_60 = arith.constant 9.99999997E-7 : f32
    %169 = vector.broadcast %cst_60 : f32 to vector<16x1xf32>
    %170 = arith.addf %166, %169 : vector<16x1xf32>
    %171 = math.rsqrt %170 : vector<16x1xf32>
    %172 = vector.broadcast %171 : vector<16x1xf32> to vector<16x32xf32>
    %173 = arith.mulf %168, %172 : vector<16x32xf32>
    %174 = vector.shape_cast %153 : vector<32xf32> to vector<1x32xf32>
    %175 = vector.broadcast %174 : vector<1x32xf32> to vector<16x32xf32>
    %176 = arith.mulf %173, %175 : vector<16x32xf32>
    %177 = vector.shape_cast %155 : vector<32xf32> to vector<1x32xf32>
    %178 = vector.broadcast %177 : vector<1x32xf32> to vector<16x32xf32>
    %179 = arith.addf %176, %178 : vector<16x32xf32>
    %180 = arith.truncf %179 : vector<16x32xf32> to vector<16x32xbf16>
    %c0_61 = arith.constant 0 : index
    %c0_62 = arith.constant 0 : index
    %181 = vector.load %arg15[%c0_61, %c0_62] : memref<32x64xbf16, #tpu.memory_space<vmem>>, vector<32x64xbf16>
    %cst_63 = arith.constant dense<0.000000e+00> : vector<16x64xf32>
    %182 = tpu.matmul %180, %181, %cst_63 {dimension_numbers = #tpu.dot_dimension_numbers<[1], [0], [0], [1], [0, 0, 1, 1], [], []>} : vector<16x32xbf16>, vector<32x64xbf16>, vector<16x64xf32> -> vector<16x64xf32>
    %c0_64 = arith.constant 0 : index
    %c0_65 = arith.constant 0 : index
    %183 = vector.load %arg16[%c0_64, %c0_65] : memref<1x64xf32, #tpu.memory_space<vmem>>, vector<1x64xf32>
    %184 = vector.shape_cast %183 : vector<1x64xf32> to vector<64xf32>
    %185 = vector.shape_cast %184 : vector<64xf32> to vector<1x64xf32>
    %186 = vector.broadcast %185 : vector<1x64xf32> to vector<16x64xf32>
    %187 = arith.addf %182, %186 : vector<16x64xf32>
    %cst_66 = arith.constant 5.000000e-01 : f32
    %188 = vector.broadcast %cst_66 : f32 to vector<16x64xf32>
    %189 = arith.mulf %188, %187 : vector<16x64xf32>
    %cst_67 = arith.constant 0.707106769 : f32
    %190 = vector.broadcast %cst_67 : f32 to vector<16x64xf32>
    %191 = arith.mulf %187, %190 : vector<16x64xf32>
    %192 = math.erf %191 : vector<16x64xf32>
    %cst_68 = arith.constant 1.000000e+00 : f32
    %193 = vector.broadcast %cst_68 : f32 to vector<16x64xf32>
    %194 = arith.addf %193, %192 : vector<16x64xf32>
    %195 = arith.mulf %189, %194 : vector<16x64xf32>
    %196 = arith.truncf %195 : vector<16x64xf32> to vector<16x64xbf16>
    %c0_69 = arith.constant 0 : index
    %c0_70 = arith.constant 0 : index
    %197 = vector.load %arg17[%c0_69, %c0_70] : memref<64x32xbf16, #tpu.memory_space<vmem>>, vector<64x32xbf16>
    %cst_71 = arith.constant dense<0.000000e+00> : vector<16x32xf32>
    %198 = tpu.matmul %196, %197, %cst_71 {dimension_numbers = #tpu.dot_dimension_numbers<[1], [0], [0], [1], [0, 0, 1, 1], [], []>} : vector<16x64xbf16>, vector<64x32xbf16>, vector<16x32xf32> -> vector<16x32xf32>
    %c0_72 = arith.constant 0 : index
    %c0_73 = arith.constant 0 : index
    %199 = vector.load %arg18[%c0_72, %c0_73] : memref<1x32xf32, #tpu.memory_space<vmem>>, vector<1x32xf32>
    %200 = vector.shape_cast %199 : vector<1x32xf32> to vector<32xf32>
    %201 = vector.shape_cast %200 : vector<32xf32> to vector<1x32xf32>
    %202 = vector.broadcast %201 : vector<1x32xf32> to vector<16x32xf32>
    %203 = arith.addf %198, %202 : vector<16x32xf32>
    %204 = arith.addf %151, %203 : vector<16x32xf32>
    %205 = vector.shape_cast %204 : vector<16x32xf32> to vector<2x8x32xf32>
    %c0_74 = arith.constant 0 : index
    %c0_75 = arith.constant 0 : index
    %c0_76 = arith.constant 0 : index
    %206 = vector.load %arg19[%c0_74, %c0_75, %c0_76] : memref<2x8x32xf32, #tpu.memory_space<vmem>>, vector<2x8x32xf32>
    tpu.vector_store %arg19[%c0_74, %c0_75, %c0_76], %205 {strides = array<i32>} : memref<2x8x32xf32, #tpu.memory_space<vmem>>, vector<2x8x32xf32>,
    return
  }
  func.func @transform_0(%arg0: i32) -> (i32, i32) {
    %c0_i32 = arith.constant 0 : i32
    %c0_i32_0 = arith.constant 0 : i32
    %c0_i32_1 = arith.constant 0 : i32
    return %c0_i32, %c0_i32_0 : i32, i32
  }
  func.func @transform_1(%arg0: i32) -> (i32, i32, i32) {
    %c0_i32 = arith.constant 0 : i32
    %c0_i32_0 = arith.constant 0 : i32
    %c0_i32_1 = arith.constant 0 : i32
    return %arg0, %c0_i32, %c0_i32_0 : i32, i32, i32
  }
  func.func @transform_2(%arg0: i32) -> (i32, i32) {
    %c0_i32 = arith.constant 0 : i32
    %c0_i32_0 = arith.constant 0 : i32
    %c0_i32_1 = arith.constant 0 : i32
    return %c0_i32, %c0_i32_0 : i32, i32
  }
  func.func @transform_3(%arg0: i32) -> (i32, i32) {
    %c0_i32 = arith.constant 0 : i32
    %c0_i32_0 = arith.constant 0 : i32
    %c0_i32_1 = arith.constant 0 : i32
    return %c0_i32, %c0_i32_0 : i32, i32
  }
  func.func @transform_4(%arg0: i32) -> (i32, i32) {
    %c0_i32 = arith.constant 0 : i32
    %c0_i32_0 = arith.constant 0 : i32
    %c0_i32_1 = arith.constant 0 : i32
    return %c0_i32, %c0_i32_0 : i32, i32
  }
  func.func @transform_5(%arg0: i32) -> (i32, i32) {
    %c0_i32 = arith.constant 0 : i32
    %c0_i32_0 = arith.constant 0 : i32
    %c0_i32_1 = arith.constant 0 : i32
    return %c0_i32, %c0_i32_0 : i32, i32
  }
  func.func @transform_6(%arg0: i32) -> (i32, i32) {
    %c0_i32 = arith.constant 0 : i32
    %c0_i32_0 = arith.constant 0 : i32
    %c0_i32_1 = arith.constant 0 : i32
    return %c0_i32, %c0_i32_0 : i32, i32
  }
  func.func @transform_7(%arg0: i32) -> (i32, i32) {
    %c0_i32 = arith.constant 0 : i32
    %c0_i32_0 = arith.constant 0 : i32
    %c0_i32_1 = arith.constant 0 : i32
    return %c0_i32, %c0_i32_0 : i32, i32
  }
  func.func @transform_8(%arg0: i32) -> (i32, i32) {
    %c0_i32 = arith.constant 0 : i32
    %c0_i32_0 = arith.constant 0 : i32
    %c0_i32_1 = arith.constant 0 : i32
    return %c0_i32, %c0_i32_0 : i32, i32
  }
  func.func @transform_9(%arg0: i32) -> (i32, i32) {
    %c0_i32 = arith.constant 0 : i32
    %c0_i32_0 = arith.constant 0 : i32
    %c0_i32_1 = arith.constant 0 : i32
    return %c0_i32, %c0_i32_0 : i32, i32
  }
  func.func @transform_10(%arg0: i32) -> (i32, i32) {
    %c0_i32 = arith.constant 0 : i32
    %c0_i32_0 = arith.constant 0 : i32
    %c0_i32_1 = arith.constant 0 : i32
    return %c0_i32, %c0_i32_0 : i32, i32
  }
  func.func @transform_11(%arg0: i32) -> (i32, i32) {
    %c0_i32 = arith.constant 0 : i32
    %c0_i32_0 = arith.constant 0 : i32
    %c0_i32_1 = arith.constant 0 : i32
    return %c0_i32, %c0_i32_0 : i32, i32
  }
  func.func @transform_12(%arg0: i32) -> (i32, i32) {
    %c0_i32 = arith.constant 0 : i32
    %c0_i32_0 = arith.constant 0 : i32
    %c0_i32_1 = arith.constant 0 : i32
    return %c0_i32, %c0_i32_0 : i32, i32
  }
  func.func @transform_13(%arg0: i32) -> (i32, i32) {
    %c0_i32 = arith.constant 0 : i32
    %c0_i32_0 = arith.constant 0 : i32
    %c0_i32_1 = arith.constant 0 : i32
    return %c0_i32, %c0_i32_0 : i32, i32
  }
  func.func @transform_14(%arg0: i32) -> (i32, i32) {
    %c0_i32 = arith.constant 0 : i32
    %c0_i32_0 = arith.constant 0 : i32
    %c0_i32_1 = arith.constant 0 : i32
    return %c0_i32, %c0_i32_0 : i32, i32
  }
  func.func @transform_15(%arg0: i32) -> (i32, i32) {
    %c0_i32 = arith.constant 0 : i32
    %c0_i32_0 = arith.constant 0 : i32
    %c0_i32_1 = arith.constant 0 : i32
    return %c0_i32, %c0_i32_0 : i32, i32
  }
  func.func @transform_16(%arg0: i32) -> (i32, i32) {
    %c0_i32 = arith.constant 0 : i32
    %c0_i32_0 = arith.constant 0 : i32
    %c0_i32_1 = arith.constant 0 : i32
    return %c0_i32, %c0_i32_0 : i32, i32
  }
  func.func @transform_17(%arg0: i32) -> (i32, i32) {
    %c0_i32 = arith.constant 0 : i32
    %c0_i32_0 = arith.constant 0 : i32
    %c0_i32_1 = arith.constant 0 : i32
    return %c0_i32, %c0_i32_0 : i32, i32
  }
  func.func @transform_18(%arg0: i32) -> (i32, i32, i32) {
    %c0_i32 = arith.constant 0 : i32
    %c0_i32_0 = arith.constant 0 : i32
    %c0_i32_1 = arith.constant 0 : i32
    return %arg0, %c0_i32, %c0_i32_0 : i32, i32, i32
  }
}

</mosaic_0001>

<bundles_post_ra>
// kernel: tpu_custom_call.1
= control target key start
LH: loop header
LB: loop body
LE: loop exit
PB: predicated region body
PF: predicated region fallthrough
CT: control target
= control target key end

     0   :  { %s2624_s0 = inlined_call_operand.hbm [shape: bf16[8,8], index: 0, kind: input, shape index: {}]   ;;  %s2625_s1 = inlined_call_operand.vmem [shape: f32[2,8,32], index: 1, kind: input, shape index: {}]   ;;  %s2626_s2 = inlined_call_operand.hbm [shape: f32[1,32], index: 2, kind: input, shape index: {}]   ;;  %s2627_s3 = inlined_call_operand.hbm [shape: f32[1,32], index: 3, kind: input, shape index: {}]   ;;  %s2628_s4 = inlined_call_operand.vmem [shape: bf16[32,32], index: 4, kind: input, shape index: {}]   ;;  %s2629_s5 = inlined_call_operand.vmem [shape: bf16[32,32], index: 5, kind: input, shape index: {}]   ;;  %s2630_s6 = inlined_call_operand.hbm [shape: bf16[32,32], index: 6, kind: input, shape index: {}]   ;;  %s2631_s7 = inlined_call_operand.hbm [shape: f32[1,32], index: 7, kind: input, shape index: {}]   ;;  %s2632_s8 = inlined_call_operand.hbm [shape: f32[1,32], index: 8, kind: input, shape index: {}]   ;;  %s2633_s9 = inlined_call_operand.hbm [shape: f32[1,32], index: 9, kind: input, shape index: {}]   ;;  %s2634_s10 = inlined_call_operand.vmem [shape: bf16[32,32], index: 10, kind: input, shape index: {}]   ;;  %s2635_s11 = inlined_call_operand.vmem [shape: f32[1,32], index: 11, kind: input, shape index: {}]   ;;  %s2636_s12 = inlined_call_operand.vmem [shape: f32[1,32], index: 12, kind: input, shape index: {}]   ;;  %s2637_s13 = inlined_call_operand.vmem [shape: f32[1,32], index: 13, kind: input, shape index: {}]   ;;  %s2638_s14 = inlined_call_operand.hbm [shape: bf16[32,64], index: 14, kind: input, shape index: {}]   ;;  %s2639_s15 = inlined_call_operand.vmem [shape: f32[1,64], index: 15, kind: input, shape index: {}]   ;;  %s2640_s16 = inlined_call_operand.vmem [shape: bf16[64,32], index: 16, kind: input, shape index: {}]   ;;  %s2641_s17 = inlined_call_operand.vmem [shape: f32[1,32], index: 17, kind: input, shape index: {}]   ;;  %s2642_s18 = inlined_call_operand.hbm [shape: f32[2,8,32], index: 18, kind: output, shape index: {}]  }
   0x1   :  { %2644 = sst [smem:[#allocation23_spill]] %s2624_s0 }
   0x2   :  { %2645 = sst [smem:[#allocation24_spill]] %s2625_s1 }
   0x3   :  { %2646 = sst [smem:[#allocation25_spill]] %s2626_s2 }
   0x4   :  { %23 = vsyncpa [#allocation3], 0 }
   0x5   :  { %24 = vsyncpa [#allocation6], 0 }
   0x6   :  { %25 = vsyncpa [#allocation9], 0 }
   0x7   :  { %26 = vsyncpa [#allocation12], 0 }
   0x8   :  { %27 = vsyncpa [#allocation15], 0 }
   0x9   :  { %28 = vsyncpa [#allocation4], 0  ;;  %s2185_s27 = smov [#allocation5]   ;;  %s2186_s29 = smov [#allocation8]  }
   0xa   :  { %s47_s28 = sshll.u32 %s2185_s27, 4  ;;  %s70_s30 = sshll.u32 %s2186_s29, 4  ;;  %s48_s28 = int_to_ptr.vmem [resolvable:$true] %s47_s28  ;;  %s71_s30 = int_to_ptr.vmem [resolvable:$true] %s70_s30 }
   0xb   :  { %s2001_s0 = scalar_lea.vmem %s48_s28, 16  ;;  %s2005_s19 = scalar_lea.vmem %s48_s28, 32 }
   0xc   :  { %p2002_p0 = scmp.ne.s32.totalorder %s48_s28, %s2001_s0  ;;  %p2006_p1 = scmp.lt.s32.totalorder %s48_s28, %s48_s28 }
   0xd   :  { %p2007_p2 = scmp.lt.s32.totalorder %s2005_s19, %s2001_s0 }
   0xf   :  { %p2008_p3 = por %p2007_p2, %p2006_p1 }
  0x11   :  { %p2009_p4 = pnand %p2008_p3, %p2002_p0 }
  0x13   :  { %2012 = shalt.err (!%p2009_p4)
}
  0x14   :  { %s2647_s21 = sld [smem:[#allocation25_spill]]  ;;  %s2021_s22 = scalar_lea.vmem %s71_s30, 256 }
  0x15   :  { %p2022_p5 = scmp.ne.s32.totalorder %s71_s30, %s2021_s22  ;;  %p2026_p6 = scmp.lt.s32.totalorder %s71_s30, %s71_s30 }
  0x16   :  { %p2027_p7 = scmp.lt.s32.totalorder %s2021_s22, %s2021_s22 }
  0x18   :  { %p2028_p8 = por %p2027_p7, %p2026_p6 }
  0x1a   :  { %50 = dma.hbm_to_vmem [thread:$0]  %s2647_s21, 16, %s48_s28, [#allocation6]  }
  0x1b   :  { %p2029_p9 = pnand %p2028_p8, %p2022_p5 }
  0x1d   :  { %2032 = shalt.err (!%p2029_p9)
}
  0x1e   :  { %s2187_s2 = smov 64   ;;  %s2188_s23 = smov 4  }
  0x1f   :  { %76 = dma.hbm_to_vmem [thread:$0]  %s2630_s6, 256, %s71_s30, [#allocation9], %s2187_s2, %s2187_s2, %s2188_s23  }
  0x20   :  { %s2189_s26 = smov [#allocation11]   ;;  %s2190_s29 = smov [#allocation2]  }
  0x21   :  { %s93_s27 = sshll.u32 %s2189_s26, 4  ;;  %s35_s28 = sshll.u32 %s2190_s29, 4  ;;  %s94_s27 = int_to_ptr.vmem [resolvable:$true] %s93_s27  ;;  %s36_s28 = int_to_ptr.vmem [resolvable:$true] %s35_s28 }
  0x22   :  { %s2041_s0 = scalar_lea.vmem %s94_s27, 16  ;;  %s2045_s19 = scalar_lea.vmem %s94_s27, 32 }
  0x23   :  { %p2042_p10 = scmp.ne.s32.totalorder %s94_s27, %s2041_s0  ;;  %p2046_p11 = scmp.lt.s32.totalorder %s94_s27, %s94_s27 }
  0x24   :  { %p2047_p12 = scmp.lt.s32.totalorder %s2045_s19, %s2041_s0 }
  0x26   :  { %p2048_p13 = por %p2047_p12, %p2046_p11 }
  0x28   :  { %p2049_p0 = pnand %p2048_p13, %p2042_p10 }
  0x2a   :  { %2052 = shalt.err (!%p2049_p0)
}
  0x2b   :  { %96 = dma.hbm_to_vmem [thread:$0]  %s2632_s8, 16, %s94_s27, [#allocation12]  }
  0x2c   :  { %s2061_s21 = scalar_lea.vmem %s36_s28, 64  ;;  %p2066_p2 = scmp.lt.s32.totalorder %s36_s28, %s36_s28 }
  0x2d   :  { %p2062_p1 = scmp.ne.s32.totalorder %s36_s28, %s2061_s21  ;;  %p2067_p3 = scmp.lt.s32.totalorder %s2061_s21, %s2061_s21 }
  0x2f   :  { %p2068_p4 = por %p2067_p3, %p2066_p2 }
  0x31   :  { %p2069_p5 = pnand %p2068_p4, %p2062_p1 }
  0x33   :  { %2072 = shalt.err (!%p2069_p5)
}
  0x34   :  { %s2648_s22 = sld [smem:[#allocation23_spill]]  ;;  %s2191_s24 = smov [#allocation7]  }
  0x35   :  { %s57_s25 = sshll.u32 %s2191_s24, 4  ;;  %s2192_s26 = smov [#allocation10]   ;;  %s58_s25 = int_to_ptr.vmem [resolvable:$true] %s57_s25 }
  0x36   :  { %s83_s29 = sshll.u32 %s2192_s26, 4  ;;  %s2081_s0 = scalar_lea.vmem %s58_s25, 16  ;;  %s84_s29 = int_to_ptr.vmem [resolvable:$true] %s83_s29 }
  0x37   :  { %p2082_p6 = scmp.ne.s32.totalorder %s58_s25, %s2081_s0  ;;  %s2085_s8 = scalar_lea.vmem %s58_s25, 32 }
  0x38   :  { %p2086_p7 = scmp.lt.s32.totalorder %s58_s25, %s58_s25  ;;  %p2087_p8 = scmp.lt.s32.totalorder %s2085_s8, %s2081_s0 }
  0x3a   :  { %38 = dma.hbm_to_vmem [thread:$0]  %s2648_s22, 64, %s36_s28, [#allocation3]  }
  0x3b   :  { %p2088_p9 = por %p2087_p8, %p2086_p7 }
  0x3d   :  { %p2089_p10 = pnand %p2088_p9, %p2082_p6 }
  0x3f   :  { %2092 = shalt.err (!%p2089_p10)
}
  0x40   :  { %60 = dma.hbm_to_vmem [thread:$0]  %s2627_s3, 16, %s58_s25, [#allocation6]  }
  0x41   :  { %s2101_s1 = scalar_lea.vmem %s84_s29, 16  ;;  %s2105_s28 = scalar_lea.vmem %s84_s29, 32 }
  0x42   :  { %p2102_p11 = scmp.ne.s32.totalorder %s84_s29, %s2101_s1  ;;  %p2106_p12 = scmp.lt.s32.totalorder %s84_s29, %s84_s29 }
  0x43   :  { %p2107_p13 = scmp.lt.s32.totalorder %s2105_s28, %s2101_s1 }
  0x45   :  { %p2108_p0 = por %p2107_p13, %p2106_p12 }
  0x47   :  { %p2109_p1 = pnand %p2108_p0, %p2102_p11 }
  0x49   :  { %2112 = shalt.err (!%p2109_p1)
}
  0x4a   :  { %86 = dma.hbm_to_vmem [thread:$0]  %s2631_s7, 16, %s84_s29, [#allocation9]  }
  0x4b   :  { %s2193_s6 = smov [#allocation13]   ;;  %s2194_s22 = smov [#allocation14]  }
  0x4c   :  { %s103_s30 = sshll.u32 %s2193_s6, 4  ;;  %s120_s24 = sshll.u32 %s2194_s22, 4  ;;  %s104_s30 = int_to_ptr.vmem [resolvable:$true] %s103_s30  ;;  %s121_s24 = int_to_ptr.vmem [resolvable:$true] %s120_s24 }
  0x4d   :  { %s2121_s26 = scalar_lea.vmem %s104_s30, 16  ;;  %s2125_s3 = scalar_lea.vmem %s104_s30, 32 }
  0x4e   :  { %p2122_p2 = scmp.ne.s32.totalorder %s104_s30, %s2121_s26  ;;  %p2126_p3 = scmp.lt.s32.totalorder %s104_s30, %s104_s30 }
  0x4f   :  { %p2127_p4 = scmp.lt.s32.totalorder %s2125_s3, %s2121_s26 }
  0x51   :  { %p2128_p5 = por %p2127_p4, %p2126_p3 }
  0x53   :  { %p2129_p6 = pnand %p2128_p5, %p2122_p2 }
  0x55   :  { %2132 = shalt.err (!%p2129_p6)
}
  0x56   :  { %106 = dma.hbm_to_vmem [thread:$0]  %s2633_s9, 16, %s104_s30, [#allocation12]  }
  0x57   :  { %s2141_s8 = scalar_lea.vmem %s121_s24, 256  ;;  %p2146_p8 = scmp.lt.s32.totalorder %s121_s24, %s121_s24 }
  0x58   :  { %p2142_p7 = scmp.ne.s32.totalorder %s121_s24, %s2141_s8  ;;  %p2147_p9 = scmp.lt.s32.totalorder %s2141_s8, %s2141_s8 }
  0x5a   :  { %p2148_p10 = por %p2147_p9, %p2146_p8 }
  0x5c   :  { %p2149_p11 = pnand %p2148_p10, %p2142_p7 }
  0x5e   :  { %2152 = shalt.err (!%p2149_p11)
}
  0x5f   :  { %126 = dma.hbm_to_vmem [thread:$0]  %s2638_s14, 256, %s121_s24, [#allocation15], %s2187_s2, %s2187_s2, %s2188_s23  }
  0x60   :  { %2173 = dma.done.wait [#allocation3], 64  }
  0x61   :  { %2174 = vsyncadd [#allocation3], 4294967232 }
  0x62   :  { %2175 = dma.done.wait [#allocation6], 32  }
  0x63   :  { %2176 = vsyncadd [#allocation6], 4294967264 }
  0x64   :  { %2177 = dma.done.wait [#allocation9], 272  }
  0x65   :  { %2178 = vsyncadd [#allocation9], 4294967024 }
  0x66   :  { %2179 = dma.done.wait [#allocation12], 32  }
  0x67   :  { %2180 = vsyncadd [#allocation12], 4294967264 }
  0x68   :  { %2181 = dma.done.wait [#allocation15], 256  }
  0x69   :  { %2182 = vsyncadd [#allocation15], 4294967040  ;;  %vm162_vm0 = vcmask 261120   ;;  %s2649_s19 = sld [smem:[#allocation24_spill]]  ;;  %v1935_v14 = vld [vmem:[%s2628_s4 + $0x8] sm:$0xff]   ;;  %v2195_v16 = vmov 0.0  }
  0x6a   :  { %v1936_v15 = vld [vmem:[%s2629_s5 + $0x8] sm:$0xff]   ;;  %1752 = vmatprep.subr.bf16.mxu0 %v2195_v16  ;;  %1760 = vmatprep.subr.bf16.mxu1 %v2195_v16  ;;  %v1937_v17 = vld [vmem:[%s2628_s4] sm:$0xff]   ;;  %vm2196_vm1 = vmmov 0   ;;  %v1939_v35 = vld [vmem:[#allocation8 + $0x8] sm:$0xff]   ;;  %vm422_vm2 = vcmask 64512   ;;  %vm546_vm3 = vcmask 1043456  }
  0x6b   :  { %1753 = vmatpush3.bf16.msra.mxu0 %v1935_v14  ;;  %1761 = vmatpush3.bf16.msra.mxu1 %v1936_v15  ;;  %v1938_v18 = vld [vmem:[%s2629_s5] sm:$0xff]   ;;  %v1940_v37 = vld [vmem:[#allocation8] sm:$0xff]   ;;  %v1648_v38 = vld [vmem:[#allocation11] ss:$0 sm:$0xff]  ;;  %s2197_s4 = smov 120   ;;  %s2198_s5 = smov 112  }
  0x6c   :  { %1754 = vmatprep.subr.bf16.mxu0 %v2195_v16  ;;  %1762 = vmatprep.subr.bf16.mxu1 %v2195_v16  ;;  %v1642_v27 = vld [vmem:[#allocation5] ss:$0 sm:$0xff]  ;;  %v1643_v31 = vld [vmem:[#allocation7] ss:$0 sm:$0xff]  ;;  %v1644_v45 = vld [vmem:[#allocation10] ss:$0 sm:$0xff] }
  0x6d   :  { %1756 = vmatprep.mubr.msk.bf16.mxu0 %vm2196_vm1, %v2195_v16  ;;  %1764 = vmatprep.mubr.msk.bf16.mxu1 %vm2196_vm1, %v2195_v16  ;;  %v1652_v52 = vld [vmem:[#allocation13] ss:$0 sm:$0xff]  ;;  %s2199_s24 = smov 104   ;;  %s2200_s26 = smov 8   ;;  %vm1334_vm4 = vcmask 130048   ;;  %vm1337_vm5 = vcmask 195584  }
  0x6e   :  { %s2201_s3 = smov 16   ;;  %s2202_s29 = smov 24   ;;  %vm1572_vm6 = vcmask 523264  }
  0x6f   :  { %v2333_v0 = vld [vmem:[%s2649_s19] sm:$0xff]  ;;  %v2338_v1 = vld [vmem:[%s2649_s19 + $0x8] sm:$0xff]  ;;  %1755 = vmatpush3.bf16.msra.mxu0 %v1937_v17  ;;  %1763 = vmatpush3.bf16.msra.mxu1 %v1938_v18  ;;  %s2203_s22 = smov [#allocation16]  }
  0x70   :  { %v163_v2 = vsel %vm162_vm0, %v2333_v0, 0.0  ;;  %v166_v3 = vsel %vm162_vm0, %v2338_v1, 0.0  ;;  %1768 = vmatprep.subr.bf16.mxu0 %v2195_v16  ;;  %1776 = vmatprep.subr.bf16.mxu1 %v2195_v16 }
  0x71   :  { %164 = vadd.xlane.f32.xlu0 %v163_v2 }
  0x75   :  { %167 = vadd.xlane.f32.xlu0 %v166_v3 }
  0xfa   :  { %v165_v4 = vpop.xlane.xlu0 %164 }
  0xfb   :  { %v170_v5 = vmul.f32 0.03125, %v165_v4 }
  0xfd   :  { %v172_v6 = vsub.f32 %v2333_v0, %v170_v5 }
  0xfe   :  { %v168_v7 = vpop.xlane.xlu0 %167 }
  0xff   :  { %v171_v8 = vmul.f32 0.03125, %v168_v7  ;;  %v174_v9 = vmul.f32 %v172_v6, %v172_v6  ;;  %v420_v7 = vld [vmem:[#allocation2] sm:$0xf] }
 0x101   :  { %v173_v10 = vsub.f32 %v2338_v1, %v171_v8  ;;  %v176_v11 = vsel %vm162_vm0, %v174_v9, 0.0  ;;  %v2413_v8 = vunpack.c.l.bf16 %v420_v7 }
 0x102   :  { %177 = vadd.xlane.f32.xlu1 %v176_v11 }
 0x103   :  { %v175_v12 = vmul.f32 %v173_v10, %v173_v10 }
 0x105   :  { %v179_v13 = vsel %vm162_vm0, %v175_v12, 0.0 }
 0x106   :  { %180 = vadd.xlane.f32.xlu1 %v179_v13 }
 0x18b   :  { %v178_v19 = vpop.xlane.xlu1 %177 }
 0x18c   :  { %v182_v20 = vmul.f32 0.03125, %v178_v19 }
 0x18e   :  { %v184_v21 = vadd.f32 1e-06, %v182_v20 }
 0x18f   :  { %v181_v22 = vpop.xlane.xlu1 %180 }
 0x190   :  { %1949 = vrsqrt.f32 %v184_v21  ;;  %v183_v23 = vmul.f32 0.03125, %v181_v22 }
 0x192   :  { %v185_v24 = vadd.f32 1e-06, %v183_v23 }
 0x194   :  { %1951 = vrsqrt.f32 %v185_v24 }
 0x19d   :  { %v1950_v25 = vpop.eup %1949 }
 0x19e   :  { %v188_v26 = vmul.f32 %v1950_v25, %v172_v6 }
 0x1a0   :  { %v196_v30 = vmul.f32 %v1642_v27, %v188_v26 }
 0x1a1   :  { %v1952_v28 = vpop.eup %1951 }
 0x1a2   :  { %v189_v29 = vmul.f32 %v1952_v28, %v173_v10  ;;  %v204_v33 = vadd.f32 %v1643_v31, %v196_v30 }
 0x1a4   :  { %v197_v32 = vmul.f32 %v1642_v27, %v189_v29 }
 0x1a6   :  { %v205_v34 = vadd.f32 %v1643_v31, %v197_v32 }
 0x1a8   :  { %v206_v36 = vpack.c.bf16 %v205_v34, %v204_v33 }
 0x1aa   :  { %1757 = vmatmul.mubr.msk.bf16.vlgmr.msra.gmra.mxu0 %vm162_vm0, %v206_v36  ;;  %1765 = vmatmul.mubr.msk.bf16.vlgmr.msra.gmra.mxu1 %vm162_vm0, %v206_v36 }
 0x1ab   :  { %1769 = vmatpush3.bf16.msra.mxu0 %v1939_v35  ;;  %1772 = vmatprep.mubr.msk.bf16.mxu0 %vm2196_vm1, %v2195_v16 }
 0x1ac   :  { %1770 = vmatprep.subr.bf16.mxu0 %v2195_v16  ;;  %1778 = vmatprep.mubr.msk.bf16.mxu1 %vm2196_vm1, %v2195_v16 }
 0x1af   :  { %1771 = vmatpush3.bf16.msra.mxu0 %v1940_v37 }
 0x1b0   :  { %1782 = vmatprep.subr.bf16.mxu0 %v2195_v16 }
 0x1b2   :  { %1773 = vmatmul.mubr.msk.bf16.vlgmr.msra.gmra.mxu0 %vm162_vm0, %v206_v36 }
 0x1b3   :  { %1784 = vmatprep.mubr.msk.bf16.mxu0 %vm2196_vm1, %v2195_v16 }
 0x26a   :  { %v267_v39 = vpop.f32.mrf.mxu0  ;;  %v332_v40 = vpop.f32.mrf.mxu1 }
 0x26b   :  { %v333_v41 = vadd.f32 %v1648_v38, %v332_v40  ;;  %v268_v53 = vadd.f32 %v1644_v45, %v267_v39 }
 0x26c   :  { %v1758_v42 = vpop.f32.mrf.mxu0  ;;  %v1766_v43 = vpop.f32.mrf.mxu1 }
 0x26d   :  { %v2381_v44 = vpack.c.bf16 %v333_v41, %v333_v41  ;;  %v2390_v59 = vpack.c.bf16 %v268_v53, %v268_v53 }
 0x26e   :  { %v270_v46 = vpop.f32.mrf.mxu0  ;;  %v335_v47 = vpop.f32.mrf.mxu1 }
 0x26f   :  { %v336_v48 = vadd.f32 %v1648_v38, %v335_v47  ;;  %v427_v49 = vsel %vm422_vm2, %v2381_v44, 0  ;;  %v271_v60 = vadd.f32 %v1644_v45, %v270_v46 }
 0x270   :  { %v1759_v50 = vpop.f32.mrf.mxu0  ;;  %v1767_v51 = vpop.f32.mrf.mxu1  ;;  %1777 = vmatpush3.bf16.xpose.msra.mxu1 %v427_v49 }
 0x271   :  { %v2385_v54 = vpack.c.bf16 %v336_v48, %v336_v48  ;;  %1788 = vmatprep.subr.bf16.mxu1 %v2195_v16  ;;  %v2401_v4 = vpack.c.bf16 %v271_v60, %v271_v60 }
 0x272   :  { %v397_v55 = vpop.f32.mrf.mxu0 }
 0x273   :  { %v398_v56 = vadd.f32 %v1652_v52, %v397_v55  ;;  %v473_v57 = vsel %vm422_vm2, %v2385_v54, 0 }
 0x274   :  { %v1774_v58 = vpop.f32.mrf.mxu0  ;;  %1783 = vmatpush3.bf16.xpose.msra.mxu0 %v473_v57 }
 0x275   :  { %v2392_v61 = vpack.c.bf16 %v398_v56, %v398_v56  ;;  %1794 = vmatprep.subr.bf16.mxu0 %v2195_v16 }
 0x276   :  { %v400_v62 = vpop.f32.mrf.mxu0 }
 0x277   :  { %v401_v63 = vadd.f32 %v1652_v52, %v400_v62  ;;  %1779 = vmatmul.mubr.msk.bf16.vlgmr.msra.gmra.mxu1 %vm422_vm2, %v2390_v59  ;;  %v548_v2 = vsel %vm546_vm3, %v2392_v61, 0 }
 0x278   :  { %v1775_v3 = vpop.f32.mrf.mxu0  ;;  %1789 = vmatpush3.bf16.msra.mxu1 %v548_v2  ;;  %1790 = vmatprep.mubr.msk.bf16.mxu1 %vm2196_vm1, %v2195_v16 }
 0x279   :  { %v2403_v5 = vpack.c.bf16 %v401_v63, %v401_v63  ;;  %1800 = vmatprep.subr.bf16.mxu1 %v2195_v16 }
 0x27b   :  { %1785 = vmatmul.mubr.msk.bf16.vlgmr.msra.gmra.mxu0 %vm422_vm2, %v2401_v4  ;;  %v594_v6 = vsel %vm546_vm3, %v2403_v5, 0 }
 0x27c   :  { %1795 = vmatpush3.bf16.msra.mxu0 %v594_v6  ;;  %1796 = vmatprep.mubr.msk.bf16.mxu0 %vm2196_vm1, %v2195_v16 }
 0x27d   :  { %1806 = vmatprep.subr.bf16.mxu0 %v2195_v16 }
 0x337   :  { %v463_v9 = vpop.f32.mrf.mxu1 }
 0x338   :  { %v515_v10 = vmul.f32 0.35355338, %v463_v9 }
 0x339   :  { %v1780_v11 = vpop.f32.mrf.mxu1 }
 0x33a   :  { %v517_v12 = vadd.f32 %v515_v10, %v2413_v8 }
 0x33b   :  { %v466_v13 = vpop.f32.mrf.mxu1  ;;  %v509_v14 = vpop.f32.mrf.mxu0 }
 0x33c   :  { %v516_v15 = vmul.f32 0.35355338, %v509_v14  ;;  %v519_v17 = vsel %vm422_vm2, %v517_v12, -inf }
 0x33d   :  { %520 = vmax.xlane.f32.xlu0 %v519_v17  ;;  %v1781_v18 = vpop.f32.mrf.mxu1  ;;  %v1786_v19 = vpop.f32.mrf.mxu0 }
 0x33e   :  { %v518_v20 = vadd.f32 %v516_v15, %v2413_v8 }
 0x33f   :  { %v512_v21 = vpop.f32.mrf.mxu0 }
 0x340   :  { %v522_v22 = vsel %vm422_vm2, %v518_v20, -inf }
 0x341   :  { %523 = vmax.xlane.f32.xlu1 %v522_v22  ;;  %v1787_v23 = vpop.f32.mrf.mxu0 }
 0x352   :  { %688 = vrot.lane.b32.xlu1 %v2385_v54, %s2197_s4 }
 0x3c6   :  { %v521_v24 = vpop.xlane.xlu0 %520 }
 0x3c7   :  { %v525_v25 = vsub.f32 %v517_v12, %v521_v24 }
 0x3c9   :  { %v527_v26 = vmul.f32 1.442695, %v525_v25 }
 0x3ca   :  { %v524_v27 = vpop.xlane.xlu1 %523 }
 0x3cb   :  { %1953 = vpow2.f32 %v527_v26  ;;  %v526_v28 = vsub.f32 %v518_v20, %v524_v27 }
 0x3cd   :  { %v529_v29 = vmul.f32 1.442695, %v526_v28 }
 0x3ce   :  { %v689_v34 = vpop.permute.xlu1 %688 }
 0x3cf   :  { %1955 = vpow2.f32 %v529_v29  ;;  %v694_v46 = vsel %vm422_vm2, %v689_v34, 0 }
 0x3d8   :  { %v1954_v30 = vpop.eup %1953 }
 0x3d9   :  { %v531_v31 = vsel %vm422_vm2, %v1954_v30, 0.0 }
 0x3da   :  { %532 = vadd.xlane.f32.xlu0 %v531_v31 }
 0x3dc   :  { %v1956_v32 = vpop.eup %1955 }
 0x3dd   :  { %v534_v33 = vsel %vm422_vm2, %v1956_v32, 0.0 }
 0x3de   :  { %535 = vadd.xlane.f32.xlu1 %v534_v33 }
 0x3ef   :  { %636 = vrot.lane.b32.xlu1 %v2390_v59, %s2197_s4 }
 0x3f0   :  { %638 = vrot.lane.b32.xlu0 %v2381_v44, %s2197_s4 }
 0x3f3   :  { %686 = vrot.lane.b32.xlu1 %v2401_v4, %s2197_s4 }
 0x463   :  { %v533_v35 = vpop.xlane.xlu0 %532 }
 0x464   :  { %1957 = vrcp.f32 %v533_v35 }
 0x467   :  { %v536_v36 = vpop.xlane.xlu1 %535  ;;  %v639_v39 = vpop.permute.xlu0 %638 }
 0x468   :  { %1959 = vrcp.f32 %v536_v36  ;;  %v644_v42 = vsel %vm422_vm2, %v639_v39, 0 }
 0x46b   :  { %v637_v47 = vpop.permute.xlu1 %636 }
 0x46f   :  { %v687_v48 = vpop.permute.xlu1 %686 }
 0x471   :  { %v1958_v37 = vpop.eup %1957 }
 0x472   :  { %v539_v38 = vmul.f32 %v1958_v37, %v1954_v30 }
 0x474   :  { %v541_v40 = vpack.c.bf16 %v539_v38, %v539_v38 }
 0x475   :  { %v1960_v41 = vpop.eup %1959 }
 0x476   :  { %1791 = vmatmul.mubr.msk.bf16.vlgmr.msra.gmra.mxu1 %vm422_vm2, %v541_v40  ;;  %v540_v43 = vmul.f32 %v1960_v41, %v1956_v32 }
 0x477   :  { %1801 = vmatpush3.bf16.xpose.msra.mxu1 %v644_v42  ;;  %1802 = vmatprep.mubr.msk.bf16.mxu1 %vm2196_vm1, %v2195_v16 }
 0x478   :  { %v542_v45 = vpack.c.bf16 %v540_v43, %v540_v43  ;;  %1812 = vmatprep.subr.bf16.mxu1 %v2195_v16 }
 0x47a   :  { %1797 = vmatmul.mubr.msk.bf16.vlgmr.msra.gmra.mxu0 %vm422_vm2, %v542_v45 }
 0x47b   :  { %1807 = vmatpush3.bf16.xpose.msra.mxu0 %v694_v46  ;;  %1808 = vmatprep.mubr.msk.bf16.mxu0 %vm2196_vm1, %v2195_v16 }
 0x47c   :  { %1818 = vmatprep.subr.bf16.mxu0 %v2195_v16 }
 0x47e   :  { %1803 = vmatmul.mubr.msk.bf16.vlgmr.msra.gmra.mxu1 %vm422_vm2, %v637_v47 }
 0x47f   :  { %1814 = vmatprep.mubr.msk.bf16.mxu1 %vm2196_vm1, %v2195_v16 }
 0x482   :  { %1809 = vmatmul.mubr.msk.bf16.vlgmr.msra.gmra.mxu0 %vm422_vm2, %v687_v48 }
 0x483   :  { %1820 = vmatprep.mubr.msk.bf16.mxu0 %vm2196_vm1, %v2195_v16 }
 0x536   :  { %v2445_v49 = vpop.f32.mrf.mxu1 }
 0x538   :  { %v1792_v50 = vpop.f32.mrf.mxu1 }
 0x53a   :  { %v587_v51 = vpop.f32.mrf.mxu1  ;;  %v2447_v52 = vpop.f32.mrf.mxu0 }
 0x53c   :  { %v1793_v53 = vpop.f32.mrf.mxu1  ;;  %v1798_v55 = vpop.f32.mrf.mxu0 }
 0x53e   :  { %v633_v56 = vpop.f32.mrf.mxu0  ;;  %v680_v57 = vpop.f32.mrf.mxu1 }
 0x53f   :  { %v736_v58 = vmul.f32 0.35355338, %v680_v57 }
 0x540   :  { %v1799_v60 = vpop.f32.mrf.mxu0  ;;  %v1804_v62 = vpop.f32.mrf.mxu1 }
 0x541   :  { %v738_v63 = vadd.f32 %v736_v58, %v2413_v8 }
 0x542   :  { %v683_v2 = vpop.f32.mrf.mxu1  ;;  %v730_v3 = vpop.f32.mrf.mxu0 }
 0x543   :  { %v737_v6 = vmul.f32 0.35355338, %v730_v3  ;;  %v740_v7 = vsel %vm422_vm2, %v738_v63, -inf }
 0x544   :  { %741 = vmax.xlane.f32.xlu0 %v740_v7  ;;  %v1805_v9 = vpop.f32.mrf.mxu1  ;;  %v1810_v10 = vpop.f32.mrf.mxu0 }
 0x545   :  { %v739_v11 = vadd.f32 %v737_v6, %v2413_v8 }
 0x546   :  { %v733_v12 = vpop.f32.mrf.mxu0 }
 0x547   :  { %v743_v13 = vsel %vm422_vm2, %v739_v11, -inf }
 0x548   :  { %744 = vmax.xlane.f32.xlu1 %v743_v13  ;;  %v1811_v14 = vpop.f32.mrf.mxu0 }
 0x559   :  { %812 = vrot.lane.b32.xlu1 %v2403_v5, %s2197_s4 }
 0x55d   :  { %862 = vrot.lane.b32.xlu1 %v2381_v44, %s2198_s5 }
 0x561   :  { %912 = vrot.lane.b32.xlu1 %v2385_v54, %s2198_s5 }
 0x565   :  { %910 = vrot.lane.b32.xlu1 %v2401_v4, %s2198_s5 }
 0x5cd   :  { %v742_v15 = vpop.xlane.xlu0 %741 }
 0x5ce   :  { %v746_v17 = vsub.f32 %v738_v63, %v742_v15 }
 0x5d0   :  { %v748_v18 = vmul.f32 1.442695, %v746_v17 }
 0x5d1   :  { %v745_v19 = vpop.xlane.xlu1 %744 }
 0x5d2   :  { %1961 = vpow2.f32 %v748_v18  ;;  %v747_v20 = vsub.f32 %v739_v11, %v745_v19 }
 0x5d4   :  { %v750_v21 = vmul.f32 1.442695, %v747_v20 }
 0x5d5   :  { %v813_v22 = vpop.permute.xlu1 %812 }
 0x5d6   :  { %1963 = vpow2.f32 %v750_v21  ;;  %v818_v23 = vsel %vm546_vm3, %v813_v22, 0 }
 0x5d7   :  { %1819 = vmatpush3.bf16.msra.mxu0 %v818_v23 }
 0x5d8   :  { %1830 = vmatprep.subr.bf16.mxu0 %v2195_v16 }
 0x5d9   :  { %v863_v33 = vpop.permute.xlu1 %862 }
 0x5da   :  { %v868_v37 = vsel %vm422_vm2, %v863_v33, 0 }
 0x5dd   :  { %v913_v39 = vpop.permute.xlu1 %912 }
 0x5de   :  { %v918_v41 = vsel %vm422_vm2, %v913_v39, 0 }
 0x5df   :  { %v1962_v24 = vpop.eup %1961 }
 0x5e0   :  { %v752_v25 = vsel %vm422_vm2, %v1962_v24, 0.0 }
 0x5e1   :  { %753 = vadd.xlane.f32.xlu0 %v752_v25  ;;  %v911_v43 = vpop.permute.xlu1 %910 }
 0x5e3   :  { %v1964_v26 = vpop.eup %1963 }
 0x5e4   :  { %v755_v27 = vsel %vm422_vm2, %v1964_v26, 0.0 }
 0x5e5   :  { %756 = vadd.xlane.f32.xlu0 %v755_v27 }
 0x5fb   :  { %764 = vrot.lane.b32.xlu0 %v2392_v61, %s2197_s4  ;;  %s1626_s4 = sshll.u32 %s2203_s22, 4  ;;  %s1627_s4 = int_to_ptr.vmem [resolvable:$true] %s1626_s4 }
 0x5fc   :  { %p2158_p13 = scmp.lt.s32.totalorder %s1627_s4, %s1627_s4 }
 0x5ff   :  { %860 = vrot.lane.b32.xlu0 %v2390_v59, %s2198_s5 }
 0x66a   :  { %v754_v28 = vpop.xlane.xlu0 %753 }
 0x66b   :  { %1965 = vrcp.f32 %v754_v28 }
 0x66e   :  { %v757_v29 = vpop.xlane.xlu0 %756 }
 0x66f   :  { %1967 = vrcp.f32 %v757_v29 }
 0x672   :  { %v765_v30 = vpop.permute.xlu0 %764 }
 0x673   :  { %v770_v31 = vsel %vm546_vm3, %v765_v30, 0 }
 0x674   :  { %1813 = vmatpush3.bf16.msra.mxu1 %v770_v31 }
 0x675   :  { %1824 = vmatprep.subr.bf16.mxu1 %v2195_v16 }
 0x676   :  { %v861_v42 = vpop.permute.xlu0 %860 }
 0x678   :  { %v1966_v32 = vpop.eup %1965 }
 0x679   :  { %v760_v34 = vmul.f32 %v1966_v32, %v1962_v24 }
 0x67b   :  { %v762_v35 = vpack.c.bf16 %v760_v34, %v760_v34 }
 0x67c   :  { %v1968_v36 = vpop.eup %1967 }
 0x67d   :  { %1815 = vmatmul.mubr.msk.bf16.vlgmr.msra.gmra.mxu1 %vm422_vm2, %v762_v35  ;;  %v761_v38 = vmul.f32 %v1968_v36, %v1964_v26 }
 0x67e   :  { %1825 = vmatpush3.bf16.xpose.msra.mxu1 %v868_v37  ;;  %1826 = vmatprep.mubr.msk.bf16.mxu1 %vm2196_vm1, %v2195_v16 }
 0x67f   :  { %v763_v40 = vpack.c.bf16 %v761_v38, %v761_v38  ;;  %1836 = vmatprep.subr.bf16.mxu1 %v2195_v16 }
 0x681   :  { %1821 = vmatmul.mubr.msk.bf16.vlgmr.msra.gmra.mxu0 %vm422_vm2, %v763_v40 }
 0x682   :  { %1831 = vmatpush3.bf16.xpose.msra.mxu0 %v918_v41  ;;  %1832 = vmatprep.mubr.msk.bf16.mxu0 %vm2196_vm1, %v2195_v16 }
 0x683   :  { %1842 = vmatprep.subr.bf16.mxu0 %v2195_v16 }
 0x685   :  { %1827 = vmatmul.mubr.msk.bf16.vlgmr.msra.gmra.mxu1 %vm422_vm2, %v861_v42 }
 0x686   :  { %1838 = vmatprep.mubr.msk.bf16.mxu1 %vm2196_vm1, %v2195_v16 }
 0x689   :  { %1833 = vmatmul.mubr.msk.bf16.vlgmr.msra.gmra.mxu0 %vm422_vm2, %v911_v43 }
 0x68a   :  { %1844 = vmatprep.mubr.msk.bf16.mxu0 %vm2196_vm1, %v2195_v16 }
 0x73d   :  { %v2487_v45 = vpop.f32.mrf.mxu1 }
 0x73f   :  { %v1816_v46 = vpop.f32.mrf.mxu1 }
 0x741   :  { %v809_v47 = vpop.f32.mrf.mxu1  ;;  %v2489_v48 = vpop.f32.mrf.mxu0 }
 0x742   :  { %v1920_v50 = vpack.i.bf16 %v2489_v48, %v2487_v45 }
 0x743   :  { %v1817_v51 = vpop.f32.mrf.mxu1  ;;  %v1822_v53 = vpop.f32.mrf.mxu0 }
 0x745   :  { %v857_v55 = vpop.f32.mrf.mxu0  ;;  %v904_v56 = vpop.f32.mrf.mxu1 }
 0x746   :  { %v960_v57 = vmul.f32 0.35355338, %v904_v56 }
 0x747   :  { %v1823_v58 = vpop.f32.mrf.mxu0  ;;  %v1828_v60 = vpop.f32.mrf.mxu1 }
 0x748   :  { %v962_v62 = vadd.f32 %v960_v57, %v2413_v8 }
 0x749   :  { %v907_v63 = vpop.f32.mrf.mxu1  ;;  %v954_v2 = vpop.f32.mrf.mxu0 }
 0x74a   :  { %v961_v3 = vmul.f32 0.35355338, %v954_v2  ;;  %v964_v6 = vsel %vm422_vm2, %v962_v62, -inf }
 0x74b   :  { %965 = vmax.xlane.f32.xlu0 %v964_v6  ;;  %v1829_v7 = vpop.f32.mrf.mxu1  ;;  %v1834_v9 = vpop.f32.mrf.mxu0 }
 0x74c   :  { %v963_v10 = vadd.f32 %v961_v3, %v2413_v8 }
 0x74d   :  { %v957_v11 = vpop.f32.mrf.mxu0 }
 0x74e   :  { %v967_v12 = vsel %vm422_vm2, %v963_v10, -inf }
 0x74f   :  { %968 = vmax.xlane.f32.xlu1 %v967_v12  ;;  %v1835_v13 = vpop.f32.mrf.mxu0 }
 0x760   :  { %1036 = vrot.lane.b32.xlu1 %v2403_v5, %s2198_s5 }
 0x764   :  { %1086 = vrot.lane.b32.xlu1 %v2381_v44, %s2199_s24 }
 0x768   :  { %1136 = vrot.lane.b32.xlu1 %v2385_v54, %s2199_s24 }
 0x76c   :  { %1134 = vrot.lane.b32.xlu1 %v2401_v4, %s2199_s24 }
 0x7d4   :  { %v966_v14 = vpop.xlane.xlu0 %965 }
 0x7d5   :  { %v970_v15 = vsub.f32 %v962_v62, %v966_v14 }
 0x7d7   :  { %v972_v17 = vmul.f32 1.442695, %v970_v15 }
 0x7d8   :  { %v969_v18 = vpop.xlane.xlu1 %968 }
 0x7d9   :  { %1969 = vpow2.f32 %v972_v17  ;;  %v971_v19 = vsub.f32 %v963_v10, %v969_v18 }
 0x7db   :  { %v974_v20 = vmul.f32 1.442695, %v971_v19 }
 0x7dc   :  { %v1037_v21 = vpop.permute.xlu1 %1036 }
 0x7dd   :  { %1971 = vpow2.f32 %v974_v20  ;;  %v1042_v22 = vsel %vm546_vm3, %v1037_v21, 0 }
 0x7de   :  { %1843 = vmatpush3.bf16.msra.mxu0 %v1042_v22 }
 0x7df   :  { %1854 = vmatprep.subr.bf16.mxu0 %v2195_v16 }
 0x7e0   :  { %v1087_v29 = vpop.permute.xlu1 %1086 }
 0x7e1   :  { %v1092_v33 = vsel %vm422_vm2, %v1087_v29, 0 }
 0x7e4   :  { %v1137_v34 = vpop.permute.xlu1 %1136 }
 0x7e5   :  { %v1142_v36 = vsel %vm422_vm2, %v1137_v34, 0 }
 0x7e6   :  { %v1970_v44 = vpop.eup %1969 }
 0x7e7   :  { %v976_v54 = vsel %vm422_vm2, %v1970_v44, 0.0 }
 0x7e8   :  { %977 = vadd.xlane.f32.xlu0 %v976_v54  ;;  %v1135_v38 = vpop.permute.xlu1 %1134 }
 0x7ea   :  { %v1972_v23 = vpop.eup %1971 }
 0x7eb   :  { %v979_v4 = vsel %vm422_vm2, %v1972_v23, 0.0 }
 0x7ec   :  { %980 = vadd.xlane.f32.xlu0 %v979_v4 }
 0x802   :  { %988 = vrot.lane.b32.xlu0 %v2392_v61, %s2198_s5  ;;  %s2153_s5 = scalar_lea.vmem %s1627_s4, 256 }
 0x803   :  { %p2154_p12 = scmp.ne.s32.totalorder %s1627_s4, %s2153_s5  ;;  %p2159_p0 = scmp.lt.s32.totalorder %s2153_s5, %s2153_s5 }
 0x805   :  { %p2160_p1 = por %p2159_p0, %p2158_p13 }
 0x806   :  { %1084 = vrot.lane.b32.xlu0 %v2390_v59, %s2199_s24 }
 0x807   :  { %p2161_p2 = pnand %p2160_p1, %p2154_p12 }
 0x871   :  { %v978_v24 = vpop.xlane.xlu0 %977 }
 0x872   :  { %1973 = vrcp.f32 %v978_v24 }
 0x875   :  { %v981_v25 = vpop.xlane.xlu0 %980 }
 0x876   :  { %1975 = vrcp.f32 %v981_v25 }
 0x879   :  { %v989_v26 = vpop.permute.xlu0 %988 }
 0x87a   :  { %v994_v27 = vsel %vm546_vm3, %v989_v26, 0  ;;  %v1941_v26 = vld [vmem:[%s2634_s10 + $0x8] sm:$0xff]  }
 0x87b   :  { %1837 = vmatpush3.bf16.msra.mxu1 %v994_v27  ;;  %v1942_v27 = vld [vmem:[%s2634_s10] sm:$0xff]  }
 0x87c   :  { %1848 = vmatprep.subr.bf16.mxu1 %v2195_v16 }
 0x87d   :  { %v1085_v37 = vpop.permute.xlu0 %1084 }
 0x87f   :  { %v1974_v28 = vpop.eup %1973 }
 0x880   :  { %v984_v30 = vmul.f32 %v1974_v28, %v1970_v44 }
 0x882   :  { %v986_v31 = vpack.c.bf16 %v984_v30, %v984_v30 }
 0x883   :  { %v1976_v32 = vpop.eup %1975 }
 0x884   :  { %1839 = vmatmul.mubr.msk.bf16.vlgmr.msra.gmra.mxu1 %vm422_vm2, %v986_v31  ;;  %v985_v59 = vmul.f32 %v1976_v32, %v1972_v23 }
 0x885   :  { %1849 = vmatpush3.bf16.xpose.msra.mxu1 %v1092_v33  ;;  %1850 = vmatprep.mubr.msk.bf16.mxu1 %vm2196_vm1, %v2195_v16 }
 0x886   :  { %v987_v35 = vpack.c.bf16 %v985_v59, %v985_v59  ;;  %1860 = vmatprep.subr.bf16.mxu1 %v2195_v16 }
 0x888   :  { %1845 = vmatmul.mubr.msk.bf16.vlgmr.msra.gmra.mxu0 %vm422_vm2, %v987_v35 }
 0x889   :  { %1855 = vmatpush3.bf16.xpose.msra.mxu0 %v1142_v36  ;;  %1856 = vmatprep.mubr.msk.bf16.mxu0 %vm2196_vm1, %v2195_v16 }
 0x88a   :  { %1866 = vmatprep.subr.bf16.mxu0 %v2195_v16 }
 0x88c   :  { %1851 = vmatmul.mubr.msk.bf16.vlgmr.msra.gmra.mxu1 %vm422_vm2, %v1085_v37 }
 0x88d   :  { %1862 = vmatprep.mubr.msk.bf16.mxu1 %vm2196_vm1, %v2195_v16 }
 0x890   :  { %1857 = vmatmul.mubr.msk.bf16.vlgmr.msra.gmra.mxu0 %vm422_vm2, %v1135_v38 }
 0x891   :  { %1868 = vmatprep.mubr.msk.bf16.mxu0 %vm2196_vm1, %v2195_v16 }
 0x944   :  { %v1030_v39 = vpop.f32.mrf.mxu1 }
 0x946   :  { %v1840_v40 = vpop.f32.mrf.mxu1 }
 0x948   :  { %v1033_v41 = vpop.f32.mrf.mxu1  ;;  %v1078_v42 = vpop.f32.mrf.mxu0 }
 0x949   :  { %v1925_v11 = vpack.i.bf16 %v1078_v42, %v1030_v39 }
 0x94a   :  { %v1841_v43 = vpop.f32.mrf.mxu1  ;;  %v1846_v46 = vpop.f32.mrf.mxu0 }
 0x94c   :  { %v1081_v47 = vpop.f32.mrf.mxu0  ;;  %v1128_v51 = vpop.f32.mrf.mxu1 }
 0x94d   :  { %v1184_v53 = vmul.f32 0.35355338, %v1128_v51 }
 0x94e   :  { %v1847_v55 = vpop.f32.mrf.mxu0  ;;  %v1852_v56 = vpop.f32.mrf.mxu1 }
 0x94f   :  { %v1186_v57 = vadd.f32 %v1184_v53, %v2413_v8 }
 0x950   :  { %v1131_v58 = vpop.f32.mrf.mxu1  ;;  %v1178_v60 = vpop.f32.mrf.mxu0 }
 0x951   :  { %v1185_v62 = vmul.f32 0.35355338, %v1178_v60  ;;  %v1188_v63 = vsel %vm422_vm2, %v1186_v57, -inf  ;;  %v1678_v60 = vld [vmem:[%s2635_s11] ss:$0 sm:$0xff] }
 0x952   :  { %1189 = vmax.xlane.f32.xlu0 %v1188_v63  ;;  %v1853_v2 = vpop.f32.mrf.mxu1  ;;  %v1858_v3 = vpop.f32.mrf.mxu0 }
 0x953   :  { %v1187_v6 = vadd.f32 %v1185_v62, %v2413_v8 }
 0x954   :  { %v1181_v7 = vpop.f32.mrf.mxu0 }
 0x955   :  { %v1191_v9 = vsel %vm422_vm2, %v1187_v6, -inf }
 0x956   :  { %1192 = vmax.xlane.f32.xlu1 %v1191_v9  ;;  %v1859_v10 = vpop.f32.mrf.mxu0 }
 0x967   :  { %1260 = vrot.lane.b32.xlu1 %v2403_v5, %s2199_s24 }
 0x96b   :  { %1921 = vrot.lane.b32.xlu1 %v1920_v50, %s2200_s26 }
 0x96f   :  { %1926 = vrot.lane.b32.xlu1 %v1925_v11, %s2201_s3 }
 0x9db   :  { %v1190_v12 = vpop.xlane.xlu0 %1189 }
 0x9dc   :  { %v1194_v13 = vsub.f32 %v1186_v57, %v1190_v12 }
 0x9de   :  { %v1196_v8 = vmul.f32 1.442695, %v1194_v13 }
 0x9df   :  { %v1193_v14 = vpop.xlane.xlu1 %1192 }
 0x9e0   :  { %1977 = vpow2.f32 %v1196_v8  ;;  %v1195_v15 = vsub.f32 %v1187_v6, %v1193_v14 }
 0x9e2   :  { %v1198_v17 = vmul.f32 1.442695, %v1195_v15 }
 0x9e3   :  { %v1261_v18 = vpop.permute.xlu1 %1260 }
 0x9e4   :  { %1979 = vpow2.f32 %v1198_v17  ;;  %v1266_v5 = vsel %vm546_vm3, %v1261_v18, 0 }
 0x9e5   :  { %1867 = vmatpush3.bf16.msra.mxu0 %v1266_v5  ;;  %v1943_v5 = vld [vmem:[#allocation14 + $0x8] sm:$0xff]  }
 0x9e6   :  { %1880 = vmatprep.subr.bf16.mxu0 %v2195_v16 }
 0x9e7   :  { %v1922_v36 = vpop.permute.xlu1 %1921 }
 0x9e8   :  { %v1924_v38 = vunpack.i.h.bf16 %v1922_v36  ;;  %v1923_v39 = vunpack.i.l.bf16 %v1922_v36 }
 0x9ea   :  { %v1333_v43 = vsel %vm422_vm2, %v2447_v52, %v1924_v38  ;;  %v1332_v46 = vsel %vm422_vm2, %v2445_v49, %v1923_v39 }
 0x9eb   :  { %v1927_v37 = vpop.permute.xlu1 %1926 }
 0x9ec   :  { %v1929_v40 = vunpack.i.h.bf16 %v1927_v37  ;;  %v1928_v41 = vunpack.i.l.bf16 %v1927_v37 }
 0x9ed   :  { %v1978_v19 = vpop.eup %1977 }
 0x9ee   :  { %v1200_v45 = vsel %vm422_vm2, %v1978_v19, 0.0  ;;  %v1335_v53 = vsel %vm1334_vm4, %v1332_v46, %v1928_v41  ;;  %v1336_v55 = vsel %vm1334_vm4, %v1333_v43, %v1929_v40 }
 0x9ef   :  { %1201 = vadd.xlane.f32.xlu0 %v1200_v45 }
 0x9f1   :  { %v1980_v48 = vpop.eup %1979 }
 0x9f2   :  { %v1203_v50 = vsel %vm422_vm2, %v1980_v48, 0.0 }
 0x9f3   :  { %1204 = vadd.xlane.f32.xlu0 %v1203_v50 }
 0xa09   :  { %1212 = vrot.lane.b32.xlu0 %v2392_v61, %s2199_s24 }
 0xa78   :  { %v1202_v20 = vpop.xlane.xlu0 %1201 }
 0xa79   :  { %1981 = vrcp.f32 %v1202_v20 }
 0xa7c   :  { %v1205_v21 = vpop.xlane.xlu0 %1204 }
 0xa7d   :  { %1983 = vrcp.f32 %v1205_v21 }
 0xa80   :  { %v1213_v22 = vpop.permute.xlu0 %1212 }
 0xa81   :  { %v1218_v44 = vsel %vm546_vm3, %v1213_v22, 0 }
 0xa82   :  { %1861 = vmatpush3.bf16.msra.mxu1 %v1218_v44 }
 0xa83   :  { %1872 = vmatprep.subr.bf16.mxu1 %v2195_v16 }
 0xa86   :  { %v1982_v54 = vpop.eup %1981 }
 0xa87   :  { %v1208_v23 = vmul.f32 %v1982_v54, %v1978_v19  ;;  %v1944_v19 = vld [vmem:[#allocation14] sm:$0xff]  }
 0xa89   :  { %v1210_v4 = vpack.c.bf16 %v1208_v23, %v1208_v23  ;;  %v1682_v23 = vld [vmem:[%s2636_s12] ss:$0 sm:$0xff] }
 0xa8a   :  { %v1984_v24 = vpop.eup %1983 }
 0xa8b   :  { %1863 = vmatmul.mubr.msk.bf16.vlgmr.msra.gmra.mxu1 %vm422_vm2, %v1210_v4  ;;  %v1209_v25 = vmul.f32 %v1984_v24, %v1980_v48 }
 0xa8c   :  { %1876 = vmatprep.mubr.msk.bf16.mxu1 %vm2196_vm1, %v2195_v16  ;;  %1873 = vmatpush3.bf16.msra.mxu1 %v1941_v26 }
 0xa8d   :  { %v1211_v61 = vpack.c.bf16 %v1209_v25, %v1209_v25  ;;  %1874 = vmatprep.subr.bf16.mxu1 %v2195_v16 }
 0xa8f   :  { %1869 = vmatmul.mubr.msk.bf16.vlgmr.msra.gmra.mxu0 %vm422_vm2, %v1211_v61  ;;  %v1683_v61 = vld [vmem:[%s2637_s13] ss:$0 sm:$0xff] }
 0xa90   :  { %1884 = vmatprep.mubr.msk.bf16.mxu0 %vm2196_vm1, %v2195_v16  ;;  %1875 = vmatpush3.bf16.msra.mxu1 %v1942_v27 }
 0xa91   :  { %1888 = vmatprep.subr.bf16.mxu1 %v2195_v16  ;;  %1881 = vmatpush3.bf16.msra.mxu0 %v1943_v5 }
 0xa92   :  { %1882 = vmatprep.subr.bf16.mxu0 %v2195_v16 }
 0xa95   :  { %1883 = vmatpush3.bf16.msra.mxu0 %v1944_v19 }
 0xb4b   :  { %v1254_v28 = vpop.f32.mrf.mxu1 }
 0xb4d   :  { %v1864_v29 = vpop.f32.mrf.mxu1 }
 0xb4f   :  { %v1257_v30 = vpop.f32.mrf.mxu1  ;;  %v1302_v31 = vpop.f32.mrf.mxu0 }
 0xb50   :  { %v1930_v32 = vpack.i.bf16 %v1302_v31, %v1254_v28  ;;  %v1945_v30 = vld [vmem:[%s2640_s16 + $0x18] sm:$0xff]   ;;  %v1946_v31 = vld [vmem:[%s2640_s16 + $0x10] sm:$0xff]  }
 0xb51   :  { %v1865_v33 = vpop.f32.mrf.mxu1  ;;  %v1870_v59 = vpop.f32.mrf.mxu0 }
 0xb52   :  { %1931 = vrot.lane.b32.xlu0 %v1930_v32, %s2202_s29  ;;  %v1947_v32 = vld [vmem:[%s2640_s16 + $0x8] sm:$0xff]   ;;  %v1948_v33 = vld [vmem:[%s2640_s16] sm:$0xff]  }
 0xb53   :  { %v1305_v34 = vpop.f32.mrf.mxu0  ;;  %v1684_v59 = vld [vmem:[%s2639_s15] ss:$0 sm:$0xff] }
 0xb55   :  { %v1871_v35 = vpop.f32.mrf.mxu0 }
 0xbc4   :  { %v1932_v42 = vpop.permute.xlu0 %1931 }
 0xbc5   :  { %v1934_v47 = vunpack.i.h.bf16 %v1932_v42  ;;  %v1933_v51 = vunpack.i.l.bf16 %v1932_v42 }
 0xbc7   :  { %v1339_v56 = vsel %vm1337_vm5, %v1336_v55, %v1934_v47  ;;  %v1338_v57 = vsel %vm1337_vm5, %v1335_v53, %v1933_v51 }
 0xbc8   :  { %v1340_v58 = vpack.c.bf16 %v1339_v56, %v1338_v57  ;;  %v1688_v57 = vld [vmem:[%s2641_s17] ss:$0 sm:$0xff] }
 0xbca   :  { %1877 = vmatmul.mubr.msk.bf16.vlgmr.msra.gmra.mxu1 %vm162_vm0, %v1340_v58 }
 0xbcb   :  { %1896 = vmatprep.mubr.msk.bf16.mxu1 %vm2196_vm1, %v2195_v16  ;;  %1889 = vmatpush3.bf16.msra.mxu1 %v1945_v30 }
 0xbcc   :  { %1890 = vmatprep.subr.bf16.mxu1 %v2195_v16 }
 0xbcf   :  { %1891 = vmatpush3.bf16.msra.mxu1 %v1946_v31 }
 0xbd0   :  { %1892 = vmatprep.subr.bf16.mxu1 %v2195_v16 }
 0xbd3   :  { %1893 = vmatpush3.bf16.msra.mxu1 %v1947_v32 }
 0xbd4   :  { %1894 = vmatprep.subr.bf16.mxu1 %v2195_v16 }
 0xbd7   :  { %1895 = vmatpush3.bf16.msra.mxu1 %v1948_v33 }
 0xc8a   :  { %v1401_v52 = vpop.f32.mrf.mxu1 }
 0xc8b   :  { %v1402_v62 = vadd.f32 %v1678_v60, %v1401_v52 }
 0xc8c   :  { %v1878_v63 = vpop.f32.mrf.mxu1 }
 0xc8d   :  { %v2574_v49 = vadd.f32 %v1402_v62, %v2333_v0 }
 0xc8e   :  { %v1404_v2 = vpop.f32.mrf.mxu1 }
 0xc8f   :  { %v1405_v3 = vadd.f32 %v1678_v60, %v1404_v2  ;;  %v1412_v6 = vsel %vm162_vm0, %v2574_v49, 0.0 }
 0xc90   :  { %1413 = vadd.xlane.f32.xlu1 %v1412_v6  ;;  %v1879_v7 = vpop.f32.mrf.mxu1 }
 0xc91   :  { %v2579_v9 = vadd.f32 %v1405_v3, %v2338_v1 }
 0xc93   :  { %v1415_v10 = vsel %vm162_vm0, %v2579_v9, 0.0 }
 0xc94   :  { %1416 = vadd.xlane.f32.xlu0 %v1415_v10 }
 0xd19   :  { %v1414_v11 = vpop.xlane.xlu1 %1413 }
 0xd1a   :  { %v1418_v12 = vmul.f32 0.03125, %v1414_v11 }
 0xd1c   :  { %v1420_v13 = vsub.f32 %v2574_v49, %v1418_v12 }
 0xd1d   :  { %v1417_v0 = vpop.xlane.xlu0 %1416 }
 0xd1e   :  { %v1419_v8 = vmul.f32 0.03125, %v1417_v0  ;;  %v1422_v14 = vmul.f32 %v1420_v13, %v1420_v13 }
 0xd20   :  { %v1421_v15 = vsub.f32 %v2579_v9, %v1419_v8  ;;  %v1424_v17 = vsel %vm162_vm0, %v1422_v14, 0.0 }
 0xd21   :  { %1425 = vadd.xlane.f32.xlu0 %v1424_v17 }
 0xd22   :  { %v1423_v18 = vmul.f32 %v1421_v15, %v1421_v15 }
 0xd24   :  { %v1427_v1 = vsel %vm162_vm0, %v1423_v18, 0.0 }
 0xd25   :  { %1428 = vadd.xlane.f32.xlu0 %v1427_v1 }
 0xdaa   :  { %v1426_v45 = vpop.xlane.xlu0 %1425 }
 0xdab   :  { %v1430_v48 = vmul.f32 0.03125, %v1426_v45 }
 0xdad   :  { %v1432_v50 = vadd.f32 1e-06, %v1430_v48 }
 0xdae   :  { %v1429_v20 = vpop.xlane.xlu0 %1428 }
 0xdaf   :  { %1985 = vrsqrt.f32 %v1432_v50  ;;  %v1431_v21 = vmul.f32 0.03125, %v1429_v20 }
 0xdb1   :  { %v1433_v22 = vadd.f32 1e-06, %v1431_v21 }
 0xdb3   :  { %1987 = vrsqrt.f32 %v1433_v22 }
 0xdbc   :  { %v1986_v44 = vpop.eup %1985 }
 0xdbd   :  { %v1436_v54 = vmul.f32 %v1986_v44, %v1420_v13 }
 0xdbf   :  { %v1444_v25 = vmul.f32 %v1682_v23, %v1436_v54 }
 0xdc0   :  { %v1988_v4 = vpop.eup %1987 }
 0xdc1   :  { %v1437_v24 = vmul.f32 %v1988_v4, %v1421_v15  ;;  %v1452_v27 = vadd.f32 %v1683_v61, %v1444_v25 }
 0xdc3   :  { %v1445_v26 = vmul.f32 %v1682_v23, %v1437_v24 }
 0xdc5   :  { %v1453_v28 = vadd.f32 %v1683_v61, %v1445_v26 }
 0xdc7   :  { %v1454_v29 = vpack.c.bf16 %v1453_v28, %v1452_v27 }
 0xdc9   :  { %1885 = vmatmul.mubr.msk.bf16.vlgmr.msra.gmra.mxu0 %vm162_vm0, %v1454_v29 }
 0xe89   :  { %v1515_v34 = vpop.f32.mrf.mxu0 }
 0xe8a   :  { %v1516_v35 = vadd.f32 %v1684_v59, %v1515_v34 }
 0xe8b   :  { %v1886_v36 = vpop.f32.mrf.mxu0 }
 0xe8c   :  { %v1524_v37 = vmul.f32 0.70710677, %v1516_v35  ;;  %v1522_v46 = vmul.f32 0.5, %v1516_v35 }
 0xe8d   :  { %v1518_v38 = vpop.f32.mrf.mxu0 }
 0xe8e   :  { %1989 = verf.f32 %v1524_v37  ;;  %v1519_v39 = vadd.f32 %v1684_v59, %v1518_v38 }
 0xe8f   :  { %v1887_v40 = vpop.f32.mrf.mxu0 }
 0xe90   :  { %v1525_v41 = vmul.f32 0.70710677, %v1519_v39  ;;  %v1523_v47 = vmul.f32 0.5, %v1519_v39 }
 0xe92   :  { %1991 = verf.f32 %v1525_v41 }
 0xe9b   :  { %v1990_v16 = vpop.eup %1989 }
 0xe9c   :  { %v1528_v42 = vadd.f32 1.0, %v1990_v16 }
 0xe9e   :  { %v1530_v53 = vmul.f32 %v1528_v42, %v1522_v46 }
 0xe9f   :  { %v1992_v43 = vpop.eup %1991 }
 0xea0   :  { %v1529_v51 = vadd.f32 1.0, %v1992_v43 }
 0xea2   :  { %v1531_v55 = vmul.f32 %v1529_v51, %v1523_v47 }
 0xea4   :  { %v1532_v56 = vpack.c.bf16 %v1531_v55, %v1530_v53 }
 0xea6   :  { %1897 = vmatmul.mubr.msk.bf16.vlgmr.msra.gmra.mxu1 %vm1572_vm6, %v1532_v56 }
 0xf66   :  { %v1610_v58 = vpop.f32.mrf.mxu1 }
 0xf67   :  { %v1611_v60 = vadd.f32 %v1688_v57, %v1610_v58 }
 0xf68   :  { %v1898_v52 = vpop.f32.mrf.mxu1 }
 0xf69   :  { %v1617_v62 = vadd.f32 %v1611_v60, %v2574_v49 }
 0xf6a   :  { %v1613_v63 = vpop.f32.mrf.mxu1 }
 0xf6b   :  { %1619 = vst.msk [vmem:[#allocation16] sm:$0xff] %vm162_vm0, %v1617_v62  ;;  %v1614_v2 = vadd.f32 %v1688_v57, %v1613_v63 }
 0xf6c   :  { %v1899_v3 = vpop.f32.mrf.mxu1 }
 0xf6d   :  { %v1618_v6 = vadd.f32 %v1614_v2, %v2579_v9 }
 0xf6f   :  { %1620 = vst.msk [vmem:[#allocation16 + $0x8] sm:$0xff] %vm162_vm0, %v1618_v6 }
 0xf70   :  { %2164 = shalt.err (!%p2161_p2)
}
 0xf71   :  { %s2204_s17 = smov 128  }
 0xf72   :  { %1632 = dma.vmem_to_hbm [thread:$0]  %s1627_s4, 256, %s2642_s18, [#allocation4], %s2204_s17, %s2204_s17, %s2200_s26  }
 0xf73   :  { %2183 = dma.done.wait [#allocation4], 256  }
 0xf74   :  { %2184 = vsyncadd [#allocation4], 4294967040 }
 0xf75   :  { %1636 = vsyncpa [#allocation3], 1 }
 0xf76   :  { %1637 = vsyncpa [#allocation6], 1 }
 0xf77   :  { %1638 = vsyncpa [#allocation9], 1 }
 0xf78   :  { %1639 = vsyncpa [#allocation12], 1 }
 0xf79   :  { %1640 = vsyncpa [#allocation15], 1 }
 0xf7a   :  { %1641 = vsyncpa [#allocation4], 1 }

</bundles_post_ra>
